<compile_context>
chip_gen: v6e
topology: v6e:2x2x1
jax: 0.10.0
libtpu: 0.0.40
codegen_flags: <defaults>
</compile_context>

<pallas_src>
import jax
import jax.numpy as jnp
from jax.experimental import pallas as pl
from jax.experimental.pallas import tpu as pltpu

NUM_HEADS = 8


def attention_pooling_kernel(x_ref, q_ref, wq_ref, wk_ref, wv_ref, wo_ref,
                             bq_ref, bk_ref, bv_ref, bo_ref, o_ref):
    # One grid step == one chunk of BB batch elements.
    # Views: x_ref (BB, S, E), q_ref (T, E), weights (E, E) pre-transposed,
    #        biases (1, E), o_ref (BB, T, E).
    BB, S, E = x_ref.shape
    T = q_ref.shape[0]
    H = NUM_HEADS
    D = E // H
    scale = 1.0 / (D ** 0.5)

    # Fold the batch chunk into the matmul M-dimension (leading-dim merge, free).
    xf = x_ref[...].reshape(BB * S, E)

    # Input projections — three large MXU matmuls. Weights were pre-transposed on
    # the host, so no per-step XLU transpose here. The 1/sqrt(D) scale is folded
    # into Q once instead of scaling every per-head (T, S) score tile.
    q = (jnp.dot(q_ref[...], wq_ref[...], preferred_element_type=jnp.float32)
         + bq_ref[...]) * scale                                                      # (T, E)
    k = jnp.dot(xf, wk_ref[...], preferred_element_type=jnp.float32) + bk_ref[...]   # (BB*S, E)
    v = jnp.dot(xf, wv_ref[...], preferred_element_type=jnp.float32) + bv_ref[...]   # (BB*S, E)

    k3 = k.reshape(BB, S, E)   # leading-dim split, free
    v3 = v.reshape(BB, S, E)

    # Per-head attention, batched over the folded batch dimension.
    # The output projection is accumulated head-by-head (rows h*D:(h+1)*D of Wo^T),
    # so no lane-dim concatenate of (T, D) slices is ever materialized and the
    # accumulator / store stay lane-dense at width E.
    acc = jnp.broadcast_to(bo_ref[...], (BB * T, E))                                  # bias-init
    for h in range(H):
        sl = slice(h * D, (h + 1) * D)
        qh = jnp.broadcast_to(q[:, sl][None, :, :], (BB, T, D))                       # (BB, T, D)
        kh = k3[:, :, sl]                                                             # (BB, S, D)
        vh = v3[:, :, sl]                                                             # (BB, S, D)

        s = jnp.einsum('btd,bsd->bts', qh, kh,
                       preferred_element_type=jnp.float32)                            # (BB, T, S)
        s = s - jnp.max(s, axis=-1, keepdims=True)
        p = jnp.exp(s)
        p = p * pl.reciprocal(jnp.sum(p, axis=-1, keepdims=True), approx=True)

        oh = jnp.einsum('bts,bsd->btd', p, vh,
                        preferred_element_type=jnp.float32)                           # (BB, T, D)
        acc = acc + jnp.dot(oh.reshape(BB * T, D), wo_ref[sl, :],
                            preferred_element_type=jnp.float32)                       # (BB*T, E)

    o_ref[...] = acc.reshape(BB, T, E).astype(o_ref.dtype)


def attention_pooling(x, queries, wq, wk, wv, wo, bq, bk, bv, bo, *, block_b=None):
    B, S, E = x.shape
    T = queries.shape[0]
    assert E % NUM_HEADS == 0

    # Pre-transpose the projection weights once on the host so the kernel's MXU
    # matmuls consume them directly (no per-step XLU transpose).
    wq_t, wk_t, wv_t, wo_t = wq.T, wk.T, wv.T, wo.T

    if block_b is None:
        # Fold batches so the K/V projection M-dimension is ~128 rows (saturates a
        # 128x128 MXU pass; larger blocks mostly add VMEM pressure). Pick the
        # largest divisor of B not exceeding that target.
        target = max(1, 128 // max(1, S))
        block_b = max(d for d in range(1, B + 1) if B % d == 0 and d <= target)
        # TODO(synk): on v7x (2 TensorCores) cap block_b at ceil(B/2) so the
        # parallel batch-chunk axis keeps >= 2 blocks and both cores are used.
    BB = block_b
    assert B % BB == 0
    grid = (B // BB,)

    def rep(shape):
        n = len(shape)
        return pl.BlockSpec(shape, lambda b, _n=n: (0,) * _n)

    return pl.pallas_call(
        attention_pooling_kernel,
        out_shape=jax.ShapeDtypeStruct((B, T, E), x.dtype),
        grid=grid,
        in_specs=[
            pl.BlockSpec((BB, S, E), lambda b: (b, 0, 0)),   # x, BB batches per step
            rep((T, E)),                                     # queries
            rep((E, E)),                                     # Wq^T
            rep((E, E)),                                     # Wk^T
            rep((E, E)),                                     # Wv^T
            rep((E, E)),                                     # Wo^T
            rep((1, E)),                                     # bq
            rep((1, E)),                                     # bk
            rep((1, E)),                                     # bv
            rep((1, E)),                                     # bo
        ],
        out_specs=pl.BlockSpec((BB, T, E), lambda b: (b, 0, 0)),
        compiler_params=pltpu.CompilerParams(
            dimension_semantics=("parallel",)),
    )(x, queries, wq_t, wk_t, wv_t, wo_t, bq, bk, bv, bo)


def reference(x, queries, wq, wk, wv, wo, bq, bk, bv, bo):
    B, S, E = x.shape
    T = queries.shape[0]
    H, D = NUM_HEADS, E // NUM_HEADS
    q = queries @ wq.T + bq                       # (T, E)
    k = x @ wk.T + bk                             # (B, S, E)
    v = x @ wv.T + bv
    qh = jnp.broadcast_to(q, (B, T, E)).reshape(B, T, H, D).transpose(0, 2, 1, 3)
    kh = k.reshape(B, S, H, D).transpose(0, 2, 1, 3)
    vh = v.reshape(B, S, H, D).transpose(0, 2, 1, 3)
    s = jnp.einsum('bhtd,bhsd->bhts', qh, kh) / jnp.sqrt(jnp.float32(D))
    p = jax.nn.softmax(s, axis=-1)
    o = jnp.einsum('bhts,bhsd->bhtd', p, vh).transpose(0, 2, 1, 3).reshape(B, T, E)
    return o @ wo.T + bo


if __name__ == "__main__":
    B, S, E, T = 2, 16, 32, 4  # batch, seq_len, hidden_dim, target_length (hidden_dim % 8 heads == 0)

    key = jax.random.PRNGKey(0)
    ks = jax.random.split(key, 10)
    x = jax.random.normal(ks[0], (B, S, E), jnp.float32)
    queries = jax.random.normal(ks[1], (T, E), jnp.float32)        # nn.Parameter(torch.randn(T, E))
    scale = (1.0 / E) ** 0.5
    wq = jax.random.normal(ks[2], (E, E), jnp.float32) * scale
    wk = jax.random.normal(ks[3], (E, E), jnp.float32) * scale
    wv = jax.random.normal(ks[4], (E, E), jnp.float32) * scale
    wo = jax.random.normal(ks[5], (E, E), jnp.float32) * scale
    bq = jax.random.normal(ks[6], (1, E), jnp.float32) * 0.02
    bk = jax.random.normal(ks[7], (1, E), jnp.float32) * 0.02
    bv = jax.random.normal(ks[8], (1, E), jnp.float32) * 0.02
    bo = jax.random.normal(ks[9], (1, E), jnp.float32) * 0.02

    out = attention_pooling(x, queries, wq, wk, wv, wo, bq, bk, bv, bo)
    out = jax.block_until_ready(out)

    ref = reference(x, queries, wq, wk, wv, wo, bq, bk, bv, bo)
    assert out.shape == (B, T, E), out.shape
    # Tolerance accounts for the intentional approximate (EUP) reciprocal in the softmax.
    err = float(jnp.max(jnp.abs(out - ref)))
    assert jnp.allclose(out, ref, atol=1e-2, rtol=1e-2), err

    print("KERNEL_OK")
</pallas_src>

<mosaic_0001>
module attributes {stable_mosaic.version = 11 : i64} {
  func.func @attention_pooling_kernel(%arg0: i32, %arg1: memref<2x16x32xf32, #tpu.memory_space<vmem>>, %arg2: memref<4x32xf32, #tpu.memory_space<vmem>>, %arg3: memref<32x32xf32, #tpu.memory_space<vmem>>, %arg4: memref<32x32xf32, #tpu.memory_space<vmem>>, %arg5: memref<32x32xf32, #tpu.memory_space<vmem>>, %arg6: memref<32x32xf32, #tpu.memory_space<vmem>>, %arg7: memref<1x32xf32, #tpu.memory_space<vmem>>, %arg8: memref<1x32xf32, #tpu.memory_space<vmem>>, %arg9: memref<1x32xf32, #tpu.memory_space<vmem>>, %arg10: memref<1x32xf32, #tpu.memory_space<vmem>>, %arg11: memref<2x4x32xf32, #tpu.memory_space<vmem>>) attributes {dimension_semantics = [#tpu.dimension_semantics<parallel>], iteration_bounds = array<i64: 1>, scalar_prefetch = 0 : i64, scratch_operands = 0 : i64, tpu.core_type = #tpu.core_type<tc>, window_params = [{transform_indices = @transform_0, window_bounds = array<i64: 2, 16, 32>}, {pipeline_mode = #tpu.pipeline_mode<synchronous>, transform_indices = @transform_1, window_bounds = array<i64: 4, 32>}, {pipeline_mode = #tpu.pipeline_mode<synchronous>, transform_indices = @transform_2, window_bounds = array<i64: 32, 32>}, {pipeline_mode = #tpu.pipeline_mode<synchronous>, transform_indices = @transform_3, window_bounds = array<i64: 32, 32>}, {pipeline_mode = #tpu.pipeline_mode<synchronous>, transform_indices = @transform_4, window_bounds = array<i64: 32, 32>}, {pipeline_mode = #tpu.pipeline_mode<synchronous>, transform_indices = @transform_5, window_bounds = array<i64: 32, 32>}, {pipeline_mode = #tpu.pipeline_mode<synchronous>, transform_indices = @transform_6, window_bounds = array<i64: 1, 32>}, {pipeline_mode = #tpu.pipeline_mode<synchronous>, transform_indices = @transform_7, window_bounds = array<i64: 1, 32>}, {pipeline_mode = #tpu.pipeline_mode<synchronous>, transform_indices = @transform_8, window_bounds = array<i64: 1, 32>}, {pipeline_mode = #tpu.pipeline_mode<synchronous>, transform_indices = @transform_9, window_bounds = array<i64: 1, 32>}, {transform_indices = @transform_10, window_bounds = array<i64: 2, 4, 32>}]} {
    %c0 = arith.constant 0 : index
    %c0_0 = arith.constant 0 : index
    %c0_1 = arith.constant 0 : index
    %0 = vector.load %arg1[%c0, %c0_0, %c0_1] : memref<2x16x32xf32, #tpu.memory_space<vmem>>, vector<2x16x32xf32>
    %1 = vector.shape_cast %0 : vector<2x16x32xf32> to vector<32x32xf32>
    %c0_2 = arith.constant 0 : index
    %c0_3 = arith.constant 0 : index
    %2 = vector.load %arg2[%c0_2, %c0_3] : memref<4x32xf32, #tpu.memory_space<vmem>>, vector<4x32xf32>
    %c0_4 = arith.constant 0 : index
    %c0_5 = arith.constant 0 : index
    %3 = vector.load %arg3[%c0_4, %c0_5] : memref<32x32xf32, #tpu.memory_space<vmem>>, vector<32x32xf32>
    %cst = arith.constant dense<0.000000e+00> : vector<4x32xf32>
    %4 = tpu.matmul %2, %3, %cst {dimension_numbers = #tpu.dot_dimension_numbers<[1], [0], [0], [1], [0, 0, 1, 1], [], []>} : vector<4x32xf32>, vector<32x32xf32>, vector<4x32xf32> -> vector<4x32xf32>
    %c0_6 = arith.constant 0 : index
    %c0_7 = arith.constant 0 : index
    %5 = vector.load %arg7[%c0_6, %c0_7] : memref<1x32xf32, #tpu.memory_space<vmem>>, vector<1x32xf32>
    %6 = vector.broadcast %5 : vector<1x32xf32> to vector<4x32xf32>
    %7 = arith.addf %4, %6 : vector<4x32xf32>
    %cst_8 = arith.constant 5.000000e-01 : f32
    %8 = vector.broadcast %cst_8 : f32 to vector<4x32xf32>
    %9 = arith.mulf %7, %8 : vector<4x32xf32>
    %c0_9 = arith.constant 0 : index
    %c0_10 = arith.constant 0 : index
    %10 = vector.load %arg4[%c0_9, %c0_10] : memref<32x32xf32, #tpu.memory_space<vmem>>, vector<32x32xf32>
    %cst_11 = arith.constant dense<0.000000e+00> : vector<32x32xf32>
    %11 = tpu.matmul %1, %10, %cst_11 {dimension_numbers = #tpu.dot_dimension_numbers<[1], [0], [0], [1], [0, 0, 1, 1], [], []>} : vector<32x32xf32>, vector<32x32xf32>, vector<32x32xf32> -> vector<32x32xf32>
    %c0_12 = arith.constant 0 : index
    %c0_13 = arith.constant 0 : index
    %12 = vector.load %arg8[%c0_12, %c0_13] : memref<1x32xf32, #tpu.memory_space<vmem>>, vector<1x32xf32>
    %13 = vector.broadcast %12 : vector<1x32xf32> to vector<32x32xf32>
    %14 = arith.addf %11, %13 : vector<32x32xf32>
    %c0_14 = arith.constant 0 : index
    %c0_15 = arith.constant 0 : index
    %15 = vector.load %arg5[%c0_14, %c0_15] : memref<32x32xf32, #tpu.memory_space<vmem>>, vector<32x32xf32>
    %cst_16 = arith.constant dense<0.000000e+00> : vector<32x32xf32>
    %16 = tpu.matmul %1, %15, %cst_16 {dimension_numbers = #tpu.dot_dimension_numbers<[1], [0], [0], [1], [0, 0, 1, 1], [], []>} : vector<32x32xf32>, vector<32x32xf32>, vector<32x32xf32> -> vector<32x32xf32>
    %c0_17 = arith.constant 0 : index
    %c0_18 = arith.constant 0 : index
    %17 = vector.load %arg9[%c0_17, %c0_18] : memref<1x32xf32, #tpu.memory_space<vmem>>, vector<1x32xf32>
    %18 = vector.broadcast %17 : vector<1x32xf32> to vector<32x32xf32>
    %19 = arith.addf %16, %18 : vector<32x32xf32>
    %20 = vector.shape_cast %14 : vector<32x32xf32> to vector<2x16x32xf32>
    %21 = vector.shape_cast %19 : vector<32x32xf32> to vector<2x16x32xf32>
    %c0_19 = arith.constant 0 : index
    %c0_20 = arith.constant 0 : index
    %22 = vector.load %arg10[%c0_19, %c0_20] : memref<1x32xf32, #tpu.memory_space<vmem>>, vector<1x32xf32>
    %23 = vector.shape_cast %22 : vector<1x32xf32> to vector<1x32xf32>
    %24 = vector.broadcast %23 : vector<1x32xf32> to vector<8x32xf32>
    %25 = vector.extract_strided_slice %9 {offsets = [0, 0], sizes = [4, 4], strides = [1, 1]} : vector<4x32xf32> to vector<4x4xf32>
    %26 = vector.shape_cast %25 : vector<4x4xf32> to vector<1x4x4xf32>
    %27 = vector.shape_cast %26 : vector<1x4x4xf32> to vector<1x4x4xf32>
    %28 = vector.broadcast %27 : vector<1x4x4xf32> to vector<2x4x4xf32>
    %29 = vector.extract_strided_slice %20 {offsets = [0, 0, 0], sizes = [2, 16, 4], strides = [1, 1, 1]} : vector<2x16x32xf32> to vector<2x16x4xf32>
    %30 = vector.extract_strided_slice %21 {offsets = [0, 0, 0], sizes = [2, 16, 4], strides = [1, 1, 1]} : vector<2x16x32xf32> to vector<2x16x4xf32>
    "tpu.trace_start"() <{level = 10 : i32, message = "btd,bsd->bts"}> : () -> ()
    %cst_21 = arith.constant dense<0.000000e+00> : vector<2x4x16xf32>
    %31 = tpu.matmul %28, %29, %cst_21 {dimension_numbers = #tpu.dot_dimension_numbers<[2], [2], [1], [1], [0, 0, 0, 1, 1, 1], [0], [0]>} : vector<2x4x4xf32>, vector<2x16x4xf32>, vector<2x4x16xf32> -> vector<2x4x16xf32>
    "tpu.trace_stop"() : () -> ()
    %cst_22 = arith.constant dense<0xFF800000> : vector<2x4xf32>
    %32 = vector.multi_reduction <maximumf>, %31, %cst_22 [2] : vector<2x4x16xf32> to vector<2x4xf32>
    %33 = vector.shape_cast %32 : vector<2x4xf32> to vector<2x4x1xf32>
    %34 = vector.broadcast %33 : vector<2x4x1xf32> to vector<2x4x16xf32>
    %35 = arith.subf %31, %34 : vector<2x4x16xf32>
    %36 = math.exp %35 : vector<2x4x16xf32>
    %cst_23 = arith.constant dense<0.000000e+00> : vector<2x4xf32>
    %37 = vector.multi_reduction <add>, %36, %cst_23 [2] : vector<2x4x16xf32> to vector<2x4xf32>
    %38 = vector.shape_cast %37 : vector<2x4xf32> to vector<2x4x1xf32>
    %39 = tpu.reciprocal %38 {approx = true} : vector<2x4x1xf32> -> vector<2x4x1xf32>
    %40 = vector.broadcast %39 : vector<2x4x1xf32> to vector<2x4x16xf32>
    %41 = arith.mulf %36, %40 : vector<2x4x16xf32>
    "tpu.trace_start"() <{level = 10 : i32, message = "bts,bsd->btd"}> : () -> ()
    %cst_24 = arith.constant dense<0.000000e+00> : vector<2x4x4xf32>
    %42 = tpu.matmul %41, %30, %cst_24 {dimension_numbers = #tpu.dot_dimension_numbers<[2], [1], [1], [2], [0, 0, 0, 1, 1, 2], [0], [0]>} : vector<2x4x16xf32>, vector<2x16x4xf32>, vector<2x4x4xf32> -> vector<2x4x4xf32>
    "tpu.trace_stop"() : () -> ()
    %43 = vector.shape_cast %42 : vector<2x4x4xf32> to vector<8x4xf32>
    %c0_25 = arith.constant 0 : index
    %c0_26 = arith.constant 0 : index
    %44 = vector.load %arg6[%c0_25, %c0_26] : memref<32x32xf32, #tpu.memory_space<vmem>>, vector<4x32xf32>
    %cst_27 = arith.constant dense<0.000000e+00> : vector<8x32xf32>
    %45 = tpu.matmul %43, %44, %cst_27 {dimension_numbers = #tpu.dot_dimension_numbers<[1], [0], [0], [1], [0, 0, 1, 1], [], []>} : vector<8x4xf32>, vector<4x32xf32>, vector<8x32xf32> -> vector<8x32xf32>
    %46 = arith.addf %24, %45 : vector<8x32xf32>
    %47 = vector.extract_strided_slice %9 {offsets = [0, 4], sizes = [4, 4], strides = [1, 1]} : vector<4x32xf32> to vector<4x4xf32>
    %48 = vector.shape_cast %47 : vector<4x4xf32> to vector<1x4x4xf32>
    %49 = vector.shape_cast %48 : vector<1x4x4xf32> to vector<1x4x4xf32>
    %50 = vector.broadcast %49 : vector<1x4x4xf32> to vector<2x4x4xf32>
    %51 = vector.extract_strided_slice %20 {offsets = [0, 0, 4], sizes = [2, 16, 4], strides = [1, 1, 1]} : vector<2x16x32xf32> to vector<2x16x4xf32>
    %52 = vector.extract_strided_slice %21 {offsets = [0, 0, 4], sizes = [2, 16, 4], strides = [1, 1, 1]} : vector<2x16x32xf32> to vector<2x16x4xf32>
    "tpu.trace_start"() <{level = 10 : i32, message = "btd,bsd->bts"}> : () -> ()
    %cst_28 = arith.constant dense<0.000000e+00> : vector<2x4x16xf32>
    %53 = tpu.matmul %50, %51, %cst_28 {dimension_numbers = #tpu.dot_dimension_numbers<[2], [2], [1], [1], [0, 0, 0, 1, 1, 1], [0], [0]>} : vector<2x4x4xf32>, vector<2x16x4xf32>, vector<2x4x16xf32> -> vector<2x4x16xf32>
    "tpu.trace_stop"() : () -> ()
    %cst_29 = arith.constant dense<0xFF800000> : vector<2x4xf32>
    %54 = vector.multi_reduction <maximumf>, %53, %cst_29 [2] : vector<2x4x16xf32> to vector<2x4xf32>
    %55 = vector.shape_cast %54 : vector<2x4xf32> to vector<2x4x1xf32>
    %56 = vector.broadcast %55 : vector<2x4x1xf32> to vector<2x4x16xf32>
    %57 = arith.subf %53, %56 : vector<2x4x16xf32>
    %58 = math.exp %57 : vector<2x4x16xf32>
    %cst_30 = arith.constant dense<0.000000e+00> : vector<2x4xf32>
    %59 = vector.multi_reduction <add>, %58, %cst_30 [2] : vector<2x4x16xf32> to vector<2x4xf32>
    %60 = vector.shape_cast %59 : vector<2x4xf32> to vector<2x4x1xf32>
    %61 = tpu.reciprocal %60 {approx = true} : vector<2x4x1xf32> -> vector<2x4x1xf32>
    %62 = vector.broadcast %61 : vector<2x4x1xf32> to vector<2x4x16xf32>
    %63 = arith.mulf %58, %62 : vector<2x4x16xf32>
    "tpu.trace_start"() <{level = 10 : i32, message = "bts,bsd->btd"}> : () -> ()
    %cst_31 = arith.constant dense<0.000000e+00> : vector<2x4x4xf32>
    %64 = tpu.matmul %63, %52, %cst_31 {dimension_numbers = #tpu.dot_dimension_numbers<[2], [1], [1], [2], [0, 0, 0, 1, 1, 2], [0], [0]>} : vector<2x4x16xf32>, vector<2x16x4xf32>, vector<2x4x4xf32> -> vector<2x4x4xf32>
    "tpu.trace_stop"() : () -> ()
    %65 = vector.shape_cast %64 : vector<2x4x4xf32> to vector<8x4xf32>
    %c4 = arith.constant 4 : index
    %c0_32 = arith.constant 0 : index
    %66 = vector.load %arg6[%c4, %c0_32] : memref<32x32xf32, #tpu.memory_space<vmem>>, vector<4x32xf32>
    %cst_33 = arith.constant dense<0.000000e+00> : vector<8x32xf32>
    %67 = tpu.matmul %65, %66, %cst_33 {dimension_numbers = #tpu.dot_dimension_numbers<[1], [0], [0], [1], [0, 0, 1, 1], [], []>} : vector<8x4xf32>, vector<4x32xf32>, vector<8x32xf32> -> vector<8x32xf32>
    %68 = arith.addf %46, %67 : vector<8x32xf32>
    %69 = vector.extract_strided_slice %9 {offsets = [0, 8], sizes = [4, 4], strides = [1, 1]} : vector<4x32xf32> to vector<4x4xf32>
    %70 = vector.shape_cast %69 : vector<4x4xf32> to vector<1x4x4xf32>
    %71 = vector.shape_cast %70 : vector<1x4x4xf32> to vector<1x4x4xf32>
    %72 = vector.broadcast %71 : vector<1x4x4xf32> to vector<2x4x4xf32>
    %73 = vector.extract_strided_slice %20 {offsets = [0, 0, 8], sizes = [2, 16, 4], strides = [1, 1, 1]} : vector<2x16x32xf32> to vector<2x16x4xf32>
    %74 = vector.extract_strided_slice %21 {offsets = [0, 0, 8], sizes = [2, 16, 4], strides = [1, 1, 1]} : vector<2x16x32xf32> to vector<2x16x4xf32>
    "tpu.trace_start"() <{level = 10 : i32, message = "btd,bsd->bts"}> : () -> ()
    %cst_34 = arith.constant dense<0.000000e+00> : vector<2x4x16xf32>
    %75 = tpu.matmul %72, %73, %cst_34 {dimension_numbers = #tpu.dot_dimension_numbers<[2], [2], [1], [1], [0, 0, 0, 1, 1, 1], [0], [0]>} : vector<2x4x4xf32>, vector<2x16x4xf32>, vector<2x4x16xf32> -> vector<2x4x16xf32>
    "tpu.trace_stop"() : () -> ()
    %cst_35 = arith.constant dense<0xFF800000> : vector<2x4xf32>
    %76 = vector.multi_reduction <maximumf>, %75, %cst_35 [2] : vector<2x4x16xf32> to vector<2x4xf32>
    %77 = vector.shape_cast %76 : vector<2x4xf32> to vector<2x4x1xf32>
    %78 = vector.broadcast %77 : vector<2x4x1xf32> to vector<2x4x16xf32>
    %79 = arith.subf %75, %78 : vector<2x4x16xf32>
    %80 = math.exp %79 : vector<2x4x16xf32>
    %cst_36 = arith.constant dense<0.000000e+00> : vector<2x4xf32>
    %81 = vector.multi_reduction <add>, %80, %cst_36 [2] : vector<2x4x16xf32> to vector<2x4xf32>
    %82 = vector.shape_cast %81 : vector<2x4xf32> to vector<2x4x1xf32>
    %83 = tpu.reciprocal %82 {approx = true} : vector<2x4x1xf32> -> vector<2x4x1xf32>
    %84 = vector.broadcast %83 : vector<2x4x1xf32> to vector<2x4x16xf32>
    %85 = arith.mulf %80, %84 : vector<2x4x16xf32>
    "tpu.trace_start"() <{level = 10 : i32, message = "bts,bsd->btd"}> : () -> ()
    %cst_37 = arith.constant dense<0.000000e+00> : vector<2x4x4xf32>
    %86 = tpu.matmul %85, %74, %cst_37 {dimension_numbers = #tpu.dot_dimension_numbers<[2], [1], [1], [2], [0, 0, 0, 1, 1, 2], [0], [0]>} : vector<2x4x16xf32>, vector<2x16x4xf32>, vector<2x4x4xf32> -> vector<2x4x4xf32>
    "tpu.trace_stop"() : () -> ()
    %87 = vector.shape_cast %86 : vector<2x4x4xf32> to vector<8x4xf32>
    %c8 = arith.constant 8 : index
    %c0_38 = arith.constant 0 : index
    %88 = vector.load %arg6[%c8, %c0_38] : memref<32x32xf32, #tpu.memory_space<vmem>>, vector<4x32xf32>
    %cst_39 = arith.constant dense<0.000000e+00> : vector<8x32xf32>
    %89 = tpu.matmul %87, %88, %cst_39 {dimension_numbers = #tpu.dot_dimension_numbers<[1], [0], [0], [1], [0, 0, 1, 1], [], []>} : vector<8x4xf32>, vector<4x32xf32>, vector<8x32xf32> -> vector<8x32xf32>
    %90 = arith.addf %68, %89 : vector<8x32xf32>
    %91 = vector.extract_strided_slice %9 {offsets = [0, 12], sizes = [4, 4], strides = [1, 1]} : vector<4x32xf32> to vector<4x4xf32>
    %92 = vector.shape_cast %91 : vector<4x4xf32> to vector<1x4x4xf32>
    %93 = vector.shape_cast %92 : vector<1x4x4xf32> to vector<1x4x4xf32>
    %94 = vector.broadcast %93 : vector<1x4x4xf32> to vector<2x4x4xf32>
    %95 = vector.extract_strided_slice %20 {offsets = [0, 0, 12], sizes = [2, 16, 4], strides = [1, 1, 1]} : vector<2x16x32xf32> to vector<2x16x4xf32>
    %96 = vector.extract_strided_slice %21 {offsets = [0, 0, 12], sizes = [2, 16, 4], strides = [1, 1, 1]} : vector<2x16x32xf32> to vector<2x16x4xf32>
    "tpu.trace_start"() <{level = 10 : i32, message = "btd,bsd->bts"}> : () -> ()
    %cst_40 = arith.constant dense<0.000000e+00> : vector<2x4x16xf32>
    %97 = tpu.matmul %94, %95, %cst_40 {dimension_numbers = #tpu.dot_dimension_numbers<[2], [2], [1], [1], [0, 0, 0, 1, 1, 1], [0], [0]>} : vector<2x4x4xf32>, vector<2x16x4xf32>, vector<2x4x16xf32> -> vector<2x4x16xf32>
    "tpu.trace_stop"() : () -> ()
    %cst_41 = arith.constant dense<0xFF800000> : vector<2x4xf32>
    %98 = vector.multi_reduction <maximumf>, %97, %cst_41 [2] : vector<2x4x16xf32> to vector<2x4xf32>
    %99 = vector.shape_cast %98 : vector<2x4xf32> to vector<2x4x1xf32>
    %100 = vector.broadcast %99 : vector<2x4x1xf32> to vector<2x4x16xf32>
    %101 = arith.subf %97, %100 : vector<2x4x16xf32>
    %102 = math.exp %101 : vector<2x4x16xf32>
    %cst_42 = arith.constant dense<0.000000e+00> : vector<2x4xf32>
    %103 = vector.multi_reduction <add>, %102, %cst_42 [2] : vector<2x4x16xf32> to vector<2x4xf32>
    %104 = vector.shape_cast %103 : vector<2x4xf32> to vector<2x4x1xf32>
    %105 = tpu.reciprocal %104 {approx = true} : vector<2x4x1xf32> -> vector<2x4x1xf32>
    %106 = vector.broadcast %105 : vector<2x4x1xf32> to vector<2x4x16xf32>
    %107 = arith.mulf %102, %106 : vector<2x4x16xf32>
    "tpu.trace_start"() <{level = 10 : i32, message = "bts,bsd->btd"}> : () -> ()
    %cst_43 = arith.constant dense<0.000000e+00> : vector<2x4x4xf32>
    %108 = tpu.matmul %107, %96, %cst_43 {dimension_numbers = #tpu.dot_dimension_numbers<[2], [1], [1], [2], [0, 0, 0, 1, 1, 2], [0], [0]>} : vector<2x4x16xf32>, vector<2x16x4xf32>, vector<2x4x4xf32> -> vector<2x4x4xf32>
    "tpu.trace_stop"() : () -> ()
    %109 = vector.shape_cast %108 : vector<2x4x4xf32> to vector<8x4xf32>
    %c12 = arith.constant 12 : index
    %c0_44 = arith.constant 0 : index
    %110 = vector.load %arg6[%c12, %c0_44] : memref<32x32xf32, #tpu.memory_space<vmem>>, vector<4x32xf32>
    %cst_45 = arith.constant dense<0.000000e+00> : vector<8x32xf32>
    %111 = tpu.matmul %109, %110, %cst_45 {dimension_numbers = #tpu.dot_dimension_numbers<[1], [0], [0], [1], [0, 0, 1, 1], [], []>} : vector<8x4xf32>, vector<4x32xf32>, vector<8x32xf32> -> vector<8x32xf32>
    %112 = arith.addf %90, %111 : vector<8x32xf32>
    %113 = vector.extract_strided_slice %9 {offsets = [0, 16], sizes = [4, 4], strides = [1, 1]} : vector<4x32xf32> to vector<4x4xf32>
    %114 = vector.shape_cast %113 : vector<4x4xf32> to vector<1x4x4xf32>
    %115 = vector.shape_cast %114 : vector<1x4x4xf32> to vector<1x4x4xf32>
    %116 = vector.broadcast %115 : vector<1x4x4xf32> to vector<2x4x4xf32>
    %117 = vector.extract_strided_slice %20 {offsets = [0, 0, 16], sizes = [2, 16, 4], strides = [1, 1, 1]} : vector<2x16x32xf32> to vector<2x16x4xf32>
    %118 = vector.extract_strided_slice %21 {offsets = [0, 0, 16], sizes = [2, 16, 4], strides = [1, 1, 1]} : vector<2x16x32xf32> to vector<2x16x4xf32>
    "tpu.trace_start"() <{level = 10 : i32, message = "btd,bsd->bts"}> : () -> ()
    %cst_46 = arith.constant dense<0.000000e+00> : vector<2x4x16xf32>
    %119 = tpu.matmul %116, %117, %cst_46 {dimension_numbers = #tpu.dot_dimension_numbers<[2], [2], [1], [1], [0, 0, 0, 1, 1, 1], [0], [0]>} : vector<2x4x4xf32>, vector<2x16x4xf32>, vector<2x4x16xf32> -> vector<2x4x16xf32>
    "tpu.trace_stop"() : () -> ()
    %cst_47 = arith.constant dense<0xFF800000> : vector<2x4xf32>
    %120 = vector.multi_reduction <maximumf>, %119, %cst_47 [2] : vector<2x4x16xf32> to vector<2x4xf32>
    %121 = vector.shape_cast %120 : vector<2x4xf32> to vector<2x4x1xf32>
    %122 = vector.broadcast %121 : vector<2x4x1xf32> to vector<2x4x16xf32>
    %123 = arith.subf %119, %122 : vector<2x4x16xf32>
    %124 = math.exp %123 : vector<2x4x16xf32>
    %cst_48 = arith.constant dense<0.000000e+00> : vector<2x4xf32>
    %125 = vector.multi_reduction <add>, %124, %cst_48 [2] : vector<2x4x16xf32> to vector<2x4xf32>
    %126 = vector.shape_cast %125 : vector<2x4xf32> to vector<2x4x1xf32>
    %127 = tpu.reciprocal %126 {approx = true} : vector<2x4x1xf32> -> vector<2x4x1xf32>
    %128 = vector.broadcast %127 : vector<2x4x1xf32> to vector<2x4x16xf32>
    %129 = arith.mulf %124, %128 : vector<2x4x16xf32>
    "tpu.trace_start"() <{level = 10 : i32, message = "bts,bsd->btd"}> : () -> ()
    %cst_49 = arith.constant dense<0.000000e+00> : vector<2x4x4xf32>
    %130 = tpu.matmul %129, %118, %cst_49 {dimension_numbers = #tpu.dot_dimension_numbers<[2], [1], [1], [2], [0, 0, 0, 1, 1, 2], [0], [0]>} : vector<2x4x16xf32>, vector<2x16x4xf32>, vector<2x4x4xf32> -> vector<2x4x4xf32>
    "tpu.trace_stop"() : () -> ()
    %131 = vector.shape_cast %130 : vector<2x4x4xf32> to vector<8x4xf32>
    %c16 = arith.constant 16 : index
    %c0_50 = arith.constant 0 : index
    %132 = vector.load %arg6[%c16, %c0_50] : memref<32x32xf32, #tpu.memory_space<vmem>>, vector<4x32xf32>
    %cst_51 = arith.constant dense<0.000000e+00> : vector<8x32xf32>
    %133 = tpu.matmul %131, %132, %cst_51 {dimension_numbers = #tpu.dot_dimension_numbers<[1], [0], [0], [1], [0, 0, 1, 1], [], []>} : vector<8x4xf32>, vector<4x32xf32>, vector<8x32xf32> -> vector<8x32xf32>
    %134 = arith.addf %112, %133 : vector<8x32xf32>
    %135 = vector.extract_strided_slice %9 {offsets = [0, 20], sizes = [4, 4], strides = [1, 1]} : vector<4x32xf32> to vector<4x4xf32>
    %136 = vector.shape_cast %135 : vector<4x4xf32> to vector<1x4x4xf32>
    %137 = vector.shape_cast %136 : vector<1x4x4xf32> to vector<1x4x4xf32>
    %138 = vector.broadcast %137 : vector<1x4x4xf32> to vector<2x4x4xf32>
    %139 = vector.extract_strided_slice %20 {offsets = [0, 0, 20], sizes = [2, 16, 4], strides = [1, 1, 1]} : vector<2x16x32xf32> to vector<2x16x4xf32>
    %140 = vector.extract_strided_slice %21 {offsets = [0, 0, 20], sizes = [2, 16, 4], strides = [1, 1, 1]} : vector<2x16x32xf32> to vector<2x16x4xf32>
    "tpu.trace_start"() <{level = 10 : i32, message = "btd,bsd->bts"}> : () -> ()
    %cst_52 = arith.constant dense<0.000000e+00> : vector<2x4x16xf32>
    %141 = tpu.matmul %138, %139, %cst_52 {dimension_numbers = #tpu.dot_dimension_numbers<[2], [2], [1], [1], [0, 0, 0, 1, 1, 1], [0], [0]>} : vector<2x4x4xf32>, vector<2x16x4xf32>, vector<2x4x16xf32> -> vector<2x4x16xf32>
    "tpu.trace_stop"() : () -> ()
    %cst_53 = arith.constant dense<0xFF800000> : vector<2x4xf32>
    %142 = vector.multi_reduction <maximumf>, %141, %cst_53 [2] : vector<2x4x16xf32> to vector<2x4xf32>
    %143 = vector.shape_cast %142 : vector<2x4xf32> to vector<2x4x1xf32>
    %144 = vector.broadcast %143 : vector<2x4x1xf32> to vector<2x4x16xf32>
    %145 = arith.subf %141, %144 : vector<2x4x16xf32>
    %146 = math.exp %145 : vector<2x4x16xf32>
    %cst_54 = arith.constant dense<0.000000e+00> : vector<2x4xf32>
    %147 = vector.multi_reduction <add>, %146, %cst_54 [2] : vector<2x4x16xf32> to vector<2x4xf32>
    %148 = vector.shape_cast %147 : vector<2x4xf32> to vector<2x4x1xf32>
    %149 = tpu.reciprocal %148 {approx = true} : vector<2x4x1xf32> -> vector<2x4x1xf32>
    %150 = vector.broadcast %149 : vector<2x4x1xf32> to vector<2x4x16xf32>
    %151 = arith.mulf %146, %150 : vector<2x4x16xf32>
    "tpu.trace_start"() <{level = 10 : i32, message = "bts,bsd->btd"}> : () -> ()
    %cst_55 = arith.constant dense<0.000000e+00> : vector<2x4x4xf32>
    %152 = tpu.matmul %151, %140, %cst_55 {dimension_numbers = #tpu.dot_dimension_numbers<[2], [1], [1], [2], [0, 0, 0, 1, 1, 2], [0], [0]>} : vector<2x4x16xf32>, vector<2x16x4xf32>, vector<2x4x4xf32> -> vector<2x4x4xf32>
    "tpu.trace_stop"() : () -> ()
    %153 = vector.shape_cast %152 : vector<2x4x4xf32> to vector<8x4xf32>
    %c20 = arith.constant 20 : index
    %c0_56 = arith.constant 0 : index
    %154 = vector.load %arg6[%c20, %c0_56] : memref<32x32xf32, #tpu.memory_space<vmem>>, vector<4x32xf32>
    %cst_57 = arith.constant dense<0.000000e+00> : vector<8x32xf32>
    %155 = tpu.matmul %153, %154, %cst_57 {dimension_numbers = #tpu.dot_dimension_numbers<[1], [0], [0], [1], [0, 0, 1, 1], [], []>} : vector<8x4xf32>, vector<4x32xf32>, vector<8x32xf32> -> vector<8x32xf32>
    %156 = arith.addf %134, %155 : vector<8x32xf32>
    %157 = vector.extract_strided_slice %9 {offsets = [0, 24], sizes = [4, 4], strides = [1, 1]} : vector<4x32xf32> to vector<4x4xf32>
    %158 = vector.shape_cast %157 : vector<4x4xf32> to vector<1x4x4xf32>
    %159 = vector.shape_cast %158 : vector<1x4x4xf32> to vector<1x4x4xf32>
    %160 = vector.broadcast %159 : vector<1x4x4xf32> to vector<2x4x4xf32>
    %161 = vector.extract_strided_slice %20 {offsets = [0, 0, 24], sizes = [2, 16, 4], strides = [1, 1, 1]} : vector<2x16x32xf32> to vector<2x16x4xf32>
    %162 = vector.extract_strided_slice %21 {offsets = [0, 0, 24], sizes = [2, 16, 4], strides = [1, 1, 1]} : vector<2x16x32xf32> to vector<2x16x4xf32>
    "tpu.trace_start"() <{level = 10 : i32, message = "btd,bsd->bts"}> : () -> ()
    %cst_58 = arith.constant dense<0.000000e+00> : vector<2x4x16xf32>
    %163 = tpu.matmul %160, %161, %cst_58 {dimension_numbers = #tpu.dot_dimension_numbers<[2], [2], [1], [1], [0, 0, 0, 1, 1, 1], [0], [0]>} : vector<2x4x4xf32>, vector<2x16x4xf32>, vector<2x4x16xf32> -> vector<2x4x16xf32>
    "tpu.trace_stop"() : () -> ()
    %cst_59 = arith.constant dense<0xFF800000> : vector<2x4xf32>
    %164 = vector.multi_reduction <maximumf>, %163, %cst_59 [2] : vector<2x4x16xf32> to vector<2x4xf32>
    %165 = vector.shape_cast %164 : vector<2x4xf32> to vector<2x4x1xf32>
    %166 = vector.broadcast %165 : vector<2x4x1xf32> to vector<2x4x16xf32>
    %167 = arith.subf %163, %166 : vector<2x4x16xf32>
    %168 = math.exp %167 : vector<2x4x16xf32>
    %cst_60 = arith.constant dense<0.000000e+00> : vector<2x4xf32>
    %169 = vector.multi_reduction <add>, %168, %cst_60 [2] : vector<2x4x16xf32> to vector<2x4xf32>
    %170 = vector.shape_cast %169 : vector<2x4xf32> to vector<2x4x1xf32>
    %171 = tpu.reciprocal %170 {approx = true} : vector<2x4x1xf32> -> vector<2x4x1xf32>
    %172 = vector.broadcast %171 : vector<2x4x1xf32> to vector<2x4x16xf32>
    %173 = arith.mulf %168, %172 : vector<2x4x16xf32>
    "tpu.trace_start"() <{level = 10 : i32, message = "bts,bsd->btd"}> : () -> ()
    %cst_61 = arith.constant dense<0.000000e+00> : vector<2x4x4xf32>
    %174 = tpu.matmul %173, %162, %cst_61 {dimension_numbers = #tpu.dot_dimension_numbers<[2], [1], [1], [2], [0, 0, 0, 1, 1, 2], [0], [0]>} : vector<2x4x16xf32>, vector<2x16x4xf32>, vector<2x4x4xf32> -> vector<2x4x4xf32>
    "tpu.trace_stop"() : () -> ()
    %175 = vector.shape_cast %174 : vector<2x4x4xf32> to vector<8x4xf32>
    %c24 = arith.constant 24 : index
    %c0_62 = arith.constant 0 : index
    %176 = vector.load %arg6[%c24, %c0_62] : memref<32x32xf32, #tpu.memory_space<vmem>>, vector<4x32xf32>
    %cst_63 = arith.constant dense<0.000000e+00> : vector<8x32xf32>
    %177 = tpu.matmul %175, %176, %cst_63 {dimension_numbers = #tpu.dot_dimension_numbers<[1], [0], [0], [1], [0, 0, 1, 1], [], []>} : vector<8x4xf32>, vector<4x32xf32>, vector<8x32xf32> -> vector<8x32xf32>
    %178 = arith.addf %156, %177 : vector<8x32xf32>
    %179 = vector.extract_strided_slice %9 {offsets = [0, 28], sizes = [4, 4], strides = [1, 1]} : vector<4x32xf32> to vector<4x4xf32>
    %180 = vector.shape_cast %179 : vector<4x4xf32> to vector<1x4x4xf32>
    %181 = vector.shape_cast %180 : vector<1x4x4xf32> to vector<1x4x4xf32>
    %182 = vector.broadcast %181 : vector<1x4x4xf32> to vector<2x4x4xf32>
    %183 = vector.extract_strided_slice %20 {offsets = [0, 0, 28], sizes = [2, 16, 4], strides = [1, 1, 1]} : vector<2x16x32xf32> to vector<2x16x4xf32>
    %184 = vector.extract_strided_slice %21 {offsets = [0, 0, 28], sizes = [2, 16, 4], strides = [1, 1, 1]} : vector<2x16x32xf32> to vector<2x16x4xf32>
    "tpu.trace_start"() <{level = 10 : i32, message = "btd,bsd->bts"}> : () -> ()
    %cst_64 = arith.constant dense<0.000000e+00> : vector<2x4x16xf32>
    %185 = tpu.matmul %182, %183, %cst_64 {dimension_numbers = #tpu.dot_dimension_numbers<[2], [2], [1], [1], [0, 0, 0, 1, 1, 1], [0], [0]>} : vector<2x4x4xf32>, vector<2x16x4xf32>, vector<2x4x16xf32> -> vector<2x4x16xf32>
    "tpu.trace_stop"() : () -> ()
    %cst_65 = arith.constant dense<0xFF800000> : vector<2x4xf32>
    %186 = vector.multi_reduction <maximumf>, %185, %cst_65 [2] : vector<2x4x16xf32> to vector<2x4xf32>
    %187 = vector.shape_cast %186 : vector<2x4xf32> to vector<2x4x1xf32>
    %188 = vector.broadcast %187 : vector<2x4x1xf32> to vector<2x4x16xf32>
    %189 = arith.subf %185, %188 : vector<2x4x16xf32>
    %190 = math.exp %189 : vector<2x4x16xf32>
    %cst_66 = arith.constant dense<0.000000e+00> : vector<2x4xf32>
    %191 = vector.multi_reduction <add>, %190, %cst_66 [2] : vector<2x4x16xf32> to vector<2x4xf32>
    %192 = vector.shape_cast %191 : vector<2x4xf32> to vector<2x4x1xf32>
    %193 = tpu.reciprocal %192 {approx = true} : vector<2x4x1xf32> -> vector<2x4x1xf32>
    %194 = vector.broadcast %193 : vector<2x4x1xf32> to vector<2x4x16xf32>
    %195 = arith.mulf %190, %194 : vector<2x4x16xf32>
    "tpu.trace_start"() <{level = 10 : i32, message = "bts,bsd->btd"}> : () -> ()
    %cst_67 = arith.constant dense<0.000000e+00> : vector<2x4x4xf32>
    %196 = tpu.matmul %195, %184, %cst_67 {dimension_numbers = #tpu.dot_dimension_numbers<[2], [1], [1], [2], [0, 0, 0, 1, 1, 2], [0], [0]>} : vector<2x4x16xf32>, vector<2x16x4xf32>, vector<2x4x4xf32> -> vector<2x4x4xf32>
    "tpu.trace_stop"() : () -> ()
    %197 = vector.shape_cast %196 : vector<2x4x4xf32> to vector<8x4xf32>
    %c28 = arith.constant 28 : index
    %c0_68 = arith.constant 0 : index
    %198 = vector.load %arg6[%c28, %c0_68] : memref<32x32xf32, #tpu.memory_space<vmem>>, vector<4x32xf32>
    %cst_69 = arith.constant dense<0.000000e+00> : vector<8x32xf32>
    %199 = tpu.matmul %197, %198, %cst_69 {dimension_numbers = #tpu.dot_dimension_numbers<[1], [0], [0], [1], [0, 0, 1, 1], [], []>} : vector<8x4xf32>, vector<4x32xf32>, vector<8x32xf32> -> vector<8x32xf32>
    %200 = arith.addf %178, %199 : vector<8x32xf32>
    %201 = vector.shape_cast %200 : vector<8x32xf32> to vector<2x4x32xf32>
    %c0_70 = arith.constant 0 : index
    %c0_71 = arith.constant 0 : index
    %c0_72 = arith.constant 0 : index
    %202 = vector.load %arg11[%c0_70, %c0_71, %c0_72] : memref<2x4x32xf32, #tpu.memory_space<vmem>>, vector<2x4x32xf32>
    tpu.vector_store %arg11[%c0_70, %c0_71, %c0_72], %201 {strides = array<i32>} : memref<2x4x32xf32, #tpu.memory_space<vmem>>, vector<2x4x32xf32>,
    return
  }
  func.func @transform_0(%arg0: i32) -> (i32, i32, i32) {
    %c0_i32 = arith.constant 0 : i32
    %c0_i32_0 = arith.constant 0 : i32
    %c0_i32_1 = arith.constant 0 : i32
    return %arg0, %c0_i32, %c0_i32_0 : i32, i32, i32
  }
  func.func @transform_1(%arg0: i32) -> (i32, i32) {
    %c0_i32 = arith.constant 0 : i32
    %c0_i32_0 = arith.constant 0 : i32
    %c0_i32_1 = arith.constant 0 : i32
    return %c0_i32, %c0_i32_0 : i32, i32
  }
  func.func @transform_2(%arg0: i32) -> (i32, i32) {
    %c0_i32 = arith.constant 0 : i32
    %c0_i32_0 = arith.constant 0 : i32
    %c0_i32_1 = arith.constant 0 : i32
    return %c0_i32, %c0_i32_0 : i32, i32
  }
  func.func @transform_3(%arg0: i32) -> (i32, i32) {
    %c0_i32 = arith.constant 0 : i32
    %c0_i32_0 = arith.constant 0 : i32
    %c0_i32_1 = arith.constant 0 : i32
    return %c0_i32, %c0_i32_0 : i32, i32
  }
  func.func @transform_4(%arg0: i32) -> (i32, i32) {
    %c0_i32 = arith.constant 0 : i32
    %c0_i32_0 = arith.constant 0 : i32
    %c0_i32_1 = arith.constant 0 : i32
    return %c0_i32, %c0_i32_0 : i32, i32
  }
  func.func @transform_5(%arg0: i32) -> (i32, i32) {
    %c0_i32 = arith.constant 0 : i32
    %c0_i32_0 = arith.constant 0 : i32
    %c0_i32_1 = arith.constant 0 : i32
    return %c0_i32, %c0_i32_0 : i32, i32
  }
  func.func @transform_6(%arg0: i32) -> (i32, i32) {
    %c0_i32 = arith.constant 0 : i32
    %c0_i32_0 = arith.constant 0 : i32
    %c0_i32_1 = arith.constant 0 : i32
    return %c0_i32, %c0_i32_0 : i32, i32
  }
  func.func @transform_7(%arg0: i32) -> (i32, i32) {
    %c0_i32 = arith.constant 0 : i32
    %c0_i32_0 = arith.constant 0 : i32
    %c0_i32_1 = arith.constant 0 : i32
    return %c0_i32, %c0_i32_0 : i32, i32
  }
  func.func @transform_8(%arg0: i32) -> (i32, i32) {
    %c0_i32 = arith.constant 0 : i32
    %c0_i32_0 = arith.constant 0 : i32
    %c0_i32_1 = arith.constant 0 : i32
    return %c0_i32, %c0_i32_0 : i32, i32
  }
  func.func @transform_9(%arg0: i32) -> (i32, i32) {
    %c0_i32 = arith.constant 0 : i32
    %c0_i32_0 = arith.constant 0 : i32
    %c0_i32_1 = arith.constant 0 : i32
    return %c0_i32, %c0_i32_0 : i32, i32
  }
  func.func @transform_10(%arg0: i32) -> (i32, i32, i32) {
    %c0_i32 = arith.constant 0 : i32
    %c0_i32_0 = arith.constant 0 : i32
    %c0_i32_1 = arith.constant 0 : i32
    return %arg0, %c0_i32, %c0_i32_0 : i32, i32, i32
  }
}

</mosaic_0001>

<bundles_post_ra>
// kernel: tpu_custom_call.1
= control target key start
LH: loop header
LB: loop body
LE: loop exit
PB: predicated region body
PF: predicated region fallthrough
CT: control target
= control target key end

     0   :  { %15 = vsyncpa [#allocation3], 0  ;;  %s5132_s0 = inlined_call_operand.hbm [shape: f32[2,16,32], index: 0, kind: input, shape index: {}]   ;;  %s5133_s1 = inlined_call_operand.hbm [shape: f32[4,32], index: 1, kind: input, shape index: {}]   ;;  %s5134_s2 = inlined_call_operand.hbm [shape: f32[32,32], index: 2, kind: input, shape index: {}]   ;;  %s5135_s3 = inlined_call_operand.hbm [shape: f32[32,32], index: 3, kind: input, shape index: {}]   ;;  %s5136_s4 = inlined_call_operand.hbm [shape: f32[32,32], index: 4, kind: input, shape index: {}]   ;;  %s5137_s5 = inlined_call_operand.hbm [shape: f32[32,32], index: 5, kind: input, shape index: {}]   ;;  %s5138_s6 = inlined_call_operand.vmem [shape: f32[1,32], index: 6, kind: input, shape index: {}]   ;;  %s5139_s7 = inlined_call_operand.vmem [shape: f32[1,32], index: 7, kind: input, shape index: {}]   ;;  %s5140_s8 = inlined_call_operand.vmem [shape: f32[1,32], index: 8, kind: input, shape index: {}]   ;;  %s5141_s9 = inlined_call_operand.vmem [shape: f32[1,32], index: 9, kind: input, shape index: {}]   ;;  %s5142_s10 = inlined_call_operand.hbm [shape: f32[2,4,32], index: 10, kind: output, shape index: {}]  }
   0x1   :  { %16 = vsyncpa [#allocation6], 0 }
   0x2   :  { %17 = vsyncpa [#allocation9], 0 }
   0x3   :  { %18 = vsyncpa [#allocation12], 0 }
   0x4   :  { %19 = vsyncpa [#allocation4], 0  ;;  %s4558_s13 = smov [#allocation5]  }
   0x5   :  { %s38_s14 = sshll.u32 %s4558_s13, 4  ;;  %s39_s14 = int_to_ptr.vmem [resolvable:$true] %s38_s14 }
   0x6   :  { %s4416_s15 = scalar_lea.vmem %s39_s14, 64  ;;  %p4421_p1 = scmp.lt.s32.totalorder %s39_s14, %s39_s14 }
   0x7   :  { %p4417_p0 = scmp.ne.s32.totalorder %s39_s14, %s4416_s15  ;;  %p4422_p2 = scmp.lt.s32.totalorder %s4416_s15, %s4416_s15 }
   0x9   :  { %p4423_p3 = por %p4422_p2, %p4421_p1 }
   0xb   :  { %p4424_p4 = pnand %p4423_p3, %p4417_p0 }
   0xd   :  { %4427 = shalt.err (!%p4424_p4)
}
   0xe   :  { %41 = dma.hbm_to_vmem [thread:$0]  %s5133_s1, 64, %s39_s14, [#allocation6]  }
   0xf   :  { %s4559_s18 = smov [#allocation8]   ;;  %s4560_s20 = smov [#allocation2]  }
  0x10   :  { %s59_s19 = sshll.u32 %s4559_s18, 4  ;;  %s25_s21 = sshll.u32 %s4560_s20, 4  ;;  %s60_s19 = int_to_ptr.vmem [resolvable:$true] %s59_s19  ;;  %s26_s21 = int_to_ptr.vmem [resolvable:$true] %s25_s21 }
  0x11   :  { %s4436_s22 = scalar_lea.vmem %s60_s19, 512  ;;  %p4441_p6 = scmp.lt.s32.totalorder %s60_s19, %s60_s19 }
  0x12   :  { %p4437_p5 = scmp.ne.s32.totalorder %s60_s19, %s4436_s22  ;;  %p4442_p7 = scmp.lt.s32.totalorder %s4436_s22, %s4436_s22 }
  0x14   :  { %p4443_p8 = por %p4442_p7, %p4441_p6 }
  0x16   :  { %p4444_p9 = pnand %p4443_p8, %p4437_p5 }
  0x18   :  { %4447 = shalt.err (!%p4444_p9)
}
  0x19   :  { %s4561_s23 = smov 128   ;;  %s4562_s24 = smov 8  }
  0x1a   :  { %65 = dma.hbm_to_vmem [thread:$0]  %s5135_s3, 512, %s60_s19, [#allocation9], %s4561_s23, %s4561_s23, %s4562_s24  }
  0x1b   :  { %s4456_s1 = scalar_lea.vmem %s26_s21, 512  ;;  %p4461_p11 = scmp.lt.s32.totalorder %s26_s21, %s26_s21 }
  0x1c   :  { %p4457_p10 = scmp.ne.s32.totalorder %s26_s21, %s4456_s1  ;;  %p4462_p12 = scmp.lt.s32.totalorder %s4456_s1, %s4456_s1 }
  0x1e   :  { %p4463_p13 = por %p4462_p12, %p4461_p11 }
  0x20   :  { %p4464_p0 = pnand %p4463_p13, %p4457_p10 }
  0x22   :  { %4467 = shalt.err (!%p4464_p0)
}
  0x23   :  { %31 = dma.hbm_to_vmem [thread:$0]  %s5132_s0, 512, %s26_s21, [#allocation3], %s4561_s23, %s4561_s23, %s4562_s24  }
  0x24   :  { %s4563_s29 = smov [#allocation7]   ;;  %s4564_s11 = smov [#allocation10]  }
  0x25   :  { %s47_s30 = sshll.u32 %s4563_s29, 4  ;;  %s71_s3 = sshll.u32 %s4564_s11, 4  ;;  %s48_s30 = int_to_ptr.vmem [resolvable:$true] %s47_s30  ;;  %s72_s3 = int_to_ptr.vmem [resolvable:$true] %s71_s3 }
  0x26   :  { %s4476_s12 = scalar_lea.vmem %s48_s30, 512  ;;  %p4481_p2 = scmp.lt.s32.totalorder %s48_s30, %s48_s30 }
  0x27   :  { %p4477_p1 = scmp.ne.s32.totalorder %s48_s30, %s4476_s12  ;;  %p4482_p3 = scmp.lt.s32.totalorder %s4476_s12, %s4476_s12 }
  0x29   :  { %p4483_p4 = por %p4482_p3, %p4481_p2 }
  0x2b   :  { %p4484_p5 = pnand %p4483_p4, %p4477_p1 }
  0x2d   :  { %4487 = shalt.err (!%p4484_p5)
}
  0x2e   :  { %53 = dma.hbm_to_vmem [thread:$0]  %s5134_s2, 512, %s48_s30, [#allocation6], %s4561_s23, %s4561_s23, %s4562_s24  }
  0x2f   :  { %s4496_s0 = scalar_lea.vmem %s72_s3, 512  ;;  %p4501_p7 = scmp.lt.s32.totalorder %s72_s3, %s72_s3 }
  0x30   :  { %p4497_p6 = scmp.ne.s32.totalorder %s72_s3, %s4496_s0  ;;  %p4502_p8 = scmp.lt.s32.totalorder %s4496_s0, %s4496_s0 }
  0x32   :  { %p4503_p9 = por %p4502_p8, %p4501_p7 }
  0x34   :  { %p4504_p10 = pnand %p4503_p9, %p4497_p6 }
  0x36   :  { %4507 = shalt.err (!%p4504_p10)
}
  0x37   :  { %77 = dma.hbm_to_vmem [thread:$0]  %s5136_s4, 512, %s72_s3, [#allocation9], %s4561_s23, %s4561_s23, %s4562_s24  }
  0x38   :  { %s4565_s17 = smov [#allocation11]  }
  0x39   :  { %s83_s18 = sshll.u32 %s4565_s17, 4  ;;  %s84_s18 = int_to_ptr.vmem [resolvable:$true] %s83_s18 }
  0x3a   :  { %s4516_s19 = scalar_lea.vmem %s84_s18, 512  ;;  %p4521_p12 = scmp.lt.s32.totalorder %s84_s18, %s84_s18 }
  0x3b   :  { %p4517_p11 = scmp.ne.s32.totalorder %s84_s18, %s4516_s19  ;;  %p4522_p13 = scmp.lt.s32.totalorder %s4516_s19, %s4516_s19 }
  0x3d   :  { %p4523_p0 = por %p4522_p13, %p4521_p12 }
  0x3f   :  { %p4524_p1 = pnand %p4523_p0, %p4517_p11 }
  0x41   :  { %4527 = shalt.err (!%p4524_p1)
}
  0x42   :  { %89 = dma.hbm_to_vmem [thread:$0]  %s5137_s5, 512, %s84_s18, [#allocation12], %s4561_s23, %s4561_s23, %s4562_s24  }
  0x43   :  { %4548 = dma.done.wait [#allocation3], 512  }
  0x44   :  { %4549 = vsyncadd [#allocation3], 4294966784 }
  0x45   :  { %4550 = dma.done.wait [#allocation6], 576  }
  0x46   :  { %4551 = vsyncadd [#allocation6], 4294966720 }
  0x47   :  { %4552 = dma.done.wait [#allocation9], 1024  }
  0x48   :  { %4553 = vsyncadd [#allocation9], 4294966272 }
  0x49   :  { %4554 = dma.done.wait [#allocation12], 512  }
  0x4a   :  { %4555 = vsyncadd [#allocation12], 4294966784  ;;  %v4566_v0 = vmov 0.0   ;;  %vm4567_vm0 = vmmov 0   ;;  %v210_v1 = vld [vmem:[#allocation8 + $0x18] sm:$0xff]  ;;  %v209_v2 = vld [vmem:[#allocation8 + $0x10] sm:$0xff] }
  0x4b   :  { %4021 = vmatprep.subr.mxu0 %v4566_v0  ;;  %4029 = vmatprep.mubr.msk.f32.mxu0 %vm4567_vm0, %v4566_v0  ;;  %v124_v3 = vld [vmem:[#allocation7 + $0x18] sm:$0xff]  ;;  %v123_v4 = vld [vmem:[#allocation7 + $0x10] sm:$0xff]  ;;  %v208_v5 = vld [vmem:[#allocation8 + $0x8] sm:$0xff]  ;;  %vm132_vm1 = vcmask 261120   ;;  %vm418_vm2 = vcmask 31744   ;;  %vm574_vm3 = vcmask 125952  }
  0x4c   :  { %4032 = vmatprep.subr.mxu1 %v210_v1  ;;  %4022 = vmatpush3.msra.mxu0 %v124_v3  ;;  %v116_v6 = vld [vmem:[#allocation2] sm:$0xff]  ;;  %v122_v8 = vld [vmem:[#allocation7 + $0x8] sm:$0xff]  ;;  %v119_v14 = vld [vmem:[#allocation2 + $0x18] sm:$0xff]  ;;  %vm597_vm4 = vcmask 130048   ;;  %vm750_vm5 = vcmask 1043456   ;;  %s4569_s23 = smov 120  }
  0x4d   :  { %4033 = vmatpush3.msra.mxu1 %v210_v1  ;;  %4023 = vmatprep.subr.mxu0 %v4566_v0  ;;  %v207_v7 = vld [vmem:[#allocation8] sm:$0xff]  ;;  %v118_v11 = vld [vmem:[#allocation2 + $0x10] sm:$0xff]  ;;  %v120_v12 = vld [vmem:[#allocation5] sm:$0xf]  ;;  %s4571_s26 = smov 112   ;;  %s4572_s1 = smov 108  }
  0x4e   :  { %4034 = vmatprep.subr.mxu1 %v209_v2  ;;  %4024 = vmatpush3.msra.mxu0 %v123_v4  ;;  %v117_v9 = vld [vmem:[#allocation2 + $0x8] sm:$0xff]  ;;  %v318_v13 = vld [vmem:[#allocation10 + $0x18] sm:$0xff]  ;;  %v317_v15 = vld [vmem:[#allocation10 + $0x10] sm:$0xff]  ;;  %s4573_s27 = smov 104   ;;  %s4574_s28 = smov 100   ;;  %vm3772_vm6 = vcmask 257024  }
  0x4f   :  { %4035 = vmatpush3.msra.mxu1 %v209_v2  ;;  %4040 = vmatprep.mubr.msk.f32.mxu1 %vm132_vm1, %v116_v6  ;;  %v121_v10 = vld [vmem:[#allocation7] sm:$0xff]  ;;  %v316_v16 = vld [vmem:[#allocation10 + $0x8] sm:$0xff]  ;;  %v3797_v18 = vld [vmem:[%s5139_s7] ss:$0 sm:$0xff]  ;;  %s4575_s29 = smov [#allocation13]  }
  0x50   :  { %4036 = vmatprep.subr.mxu1 %v208_v5  ;;  %4025 = vmatprep.subr.mxu0 %v4566_v0  ;;  %v315_v17 = vld [vmem:[#allocation10] sm:$0xff]  ;;  %v3795_v19 = vld [vmem:[%s5138_s6] ss:$0 sm:$0xff]  ;;  %s3780_s30 = sshll.u32 %s4575_s29, 4  ;;  %s3781_s30 = int_to_ptr.vmem [resolvable:$true] %s3780_s30 }
  0x51   :  { %4037 = vmatpush3.msra.mxu1 %v208_v5  ;;  %4026 = vmatpush3.msra.mxu0 %v122_v8  ;;  %v3802_v32 = vld [vmem:[%s5140_s8] ss:$0 sm:$0xff]  ;;  %s4568_s8 = smov 124   ;;  %v744_v4 = vld [vmem:[#allocation11] sm:$0xf]  ;;  %s4528_s11 = scalar_lea.vmem %s3781_s30, 128 }
  0x52   :  { %4038 = vmatprep.subr.mxu1 %v207_v7  ;;  %4027 = vmatprep.subr.mxu0 %v4566_v0  ;;  %p4529_p2 = scmp.ne.s32.totalorder %s3781_s30, %s4528_s11  ;;  %p4533_p3 = scmp.lt.s32.totalorder %s3781_s30, %s3781_s30 }
  0x53   :  { %4039 = vmatpush3.msra.mxu1 %v207_v7  ;;  %4028 = vmatpush3.msra.mxu0 %v121_v10  ;;  %p4534_p4 = scmp.lt.s32.totalorder %s4528_s11, %s4528_s11 }
  0x54   :  { %4041 = vmatmul.mubr.msk.f32.vlgmr.msra.gmra.mxu1 %vm132_vm1, %v117_v9  ;;  %4030 = vmatmul.mubr.msk.f32.vlgmr.msra.gmra.mxu0 %vm132_vm1, %v120_v12 }
  0x55   :  { %4043 = vmatprep.mubr.msk.f32.mxu1 %vm132_vm1, %v118_v11  ;;  %4046 = vmatprep.subr.mxu0 %v318_v13  ;;  %p4535_p5 = por %p4534_p4, %p4533_p3 }
  0x56   :  { %4060 = vmatprep.subr.mxu1 %v4566_v0  ;;  %4047 = vmatpush3.msra.mxu0 %v318_v13 }
  0x57   :  { %4054 = vmatprep.mubr.msk.f32.mxu0 %vm132_vm1, %v116_v6  ;;  %4048 = vmatprep.subr.mxu0 %v317_v15  ;;  %p4536_p6 = pnand %p4535_p5, %p4529_p2 }
  0x58   :  { %4044 = vmatmul.mubr.msk.f32.gmra.mxu1 %vm132_vm1, %v119_v14  ;;  %4049 = vmatpush3.msra.mxu0 %v317_v15 }
  0x59   :  { %4064 = vmatprep.mubr.msk.f32.mxu1 %vm4567_vm0, %v4566_v0  ;;  %4050 = vmatprep.subr.mxu0 %v316_v16 }
  0x5a   :  { %4051 = vmatpush3.msra.mxu0 %v316_v16 }
  0x5b   :  { %4052 = vmatprep.subr.mxu0 %v315_v17 }
  0x5c   :  { %4053 = vmatpush3.msra.mxu0 %v315_v17 }
  0x5d   :  { %4055 = vmatmul.mubr.msk.f32.vlgmr.msra.gmra.mxu0 %vm132_vm1, %v117_v9  ;;  %4067 = vmatprep.subr.mxu0 %v4566_v0 }
  0x5e   :  { %4057 = vmatprep.mubr.msk.f32.mxu0 %vm132_vm1, %v118_v11 }
  0x61   :  { %4058 = vmatmul.mubr.msk.f32.gmra.mxu0 %vm132_vm1, %v119_v14 }
  0x62   :  { %4071 = vmatprep.mubr.msk.f32.mxu0 %vm4567_vm0, %v4566_v0 }
 0x114   :  { %v4042_v20 = vpop.f32.mrf.mxu1  ;;  %v202_v22 = vpop.f32.mrf.mxu0 }
 0x115   :  { %v4693_v21 = vadd.f32 %v4042_v20, %v3797_v18  ;;  %v203_v24 = vadd.f32 %v3795_v19, %v202_v22 }
 0x116   :  { %v296_v23 = vpop.f32.mrf.mxu1  ;;  %v4031_v25 = vpop.f32.mrf.mxu0 }
 0x117   :  { %4061 = vmatpush3.xpose.msk.msra.mxu1 %vm418_vm2, %v4693_v21  ;;  %v4698_v27 = vadd.f32 %v3797_v18, %v296_v23  ;;  %v4702_v29 = vmul.f32 0.5, %v203_v24 }
 0x118   :  { %v4045_v26 = vpop.f32.mrf.mxu1  ;;  %4062 = vmatprep.subr.mxu1 %v4566_v0 }
 0x119   :  { %v4700_v28 = vadd.f32 %v4045_v26, %v3797_v18 }
 0x11a   :  { %v306_v30 = vpop.f32.mrf.mxu1 }
 0x11b   :  { %4063 = vmatpush3.xpose.msk.msra.mxu1 %vm418_vm2, %v4698_v27  ;;  %4068 = vmatpush3.xpose.msk.msra.mxu0 %vm418_vm2, %v4700_v28  ;;  %v4710_v31 = vadd.f32 %v3797_v18, %v306_v30 }
 0x11c   :  { %4069 = vmatprep.subr.mxu0 %v4566_v0  ;;  %4074 = vmatprep.subr.mxu1 %v4566_v0 }
 0x11d   :  { %v4056_v33 = vpop.f32.mrf.mxu0 }
 0x11e   :  { %4065 = vmatmul.mubr.msk.f32.vlgmr.msra.gmra.mxu1 %vm418_vm2, %v4702_v29  ;;  %v4726_v34 = vadd.f32 %v4056_v33, %v3802_v32 }
 0x11f   :  { %4070 = vmatpush3.xpose.msk.msra.mxu0 %vm418_vm2, %v4710_v31  ;;  %4078 = vmatprep.mubr.msk.f32.mxu1 %vm4567_vm0, %v4566_v0  ;;  %v392_v35 = vpop.f32.mrf.mxu0 }
 0x120   :  { %4088 = vmatprep.subr.mxu0 %v4566_v0  ;;  %v4728_v36 = vadd.f32 %v3802_v32, %v392_v35  ;;  %4075 = vmatpush3.msra.mxu1 %v4726_v34 }
 0x121   :  { %v4059_v37 = vpop.f32.mrf.mxu0  ;;  %4076 = vmatprep.subr.mxu1 %v4566_v0 }
 0x122   :  { %4072 = vmatmul.mubr.msk.f32.vlgmr.msra.gmra.mxu0 %vm418_vm2, %v4702_v29  ;;  %v4732_v38 = vadd.f32 %v4059_v37, %v3802_v32  ;;  %4077 = vmatpush3.msra.mxu1 %v4728_v36 }
 0x123   :  { %4090 = vmatprep.mubr.msk.f32.mxu0 %vm4567_vm0, %v4566_v0  ;;  %4081 = vmatprep.subr.mxu1 %v4566_v0  ;;  %v402_v41 = vpop.f32.mrf.mxu0 }
 0x124   :  { %v4751_v61 = vadd.f32 %v3802_v32, %v402_v41  ;;  %4089 = vmatpush3.msk.msra.mxu0 %vm750_vm5, %v744_v4  ;;  %v3807_v4 = vld [vmem:[%s5141_s9] ss:$0 sm:$0xff]  ;;  %s4570_s9 = smov 116  }
 0x125   :  { %4100 = vmatprep.subr.mxu0 %v4566_v0 }
 0x1de   :  { %v494_v39 = vpop.f32.mrf.mxu1 }
 0x1df   :  { %v575_v40 = vsel %vm574_vm3, %v494_v39, -inf }
 0x1e0   :  { %576 = vmax.xlane.f32.xlu0 %v575_v40  ;;  %v4066_v42 = vpop.f32.mrf.mxu1 }
 0x1e2   :  { %v570_v43 = vpop.f32.mrf.mxu0 }
 0x1e3   :  { %v578_v44 = vsel %vm574_vm3, %v570_v43, -inf }
 0x1e4   :  { %v4073_v45 = vpop.f32.mrf.mxu0  ;;  %579 = vmax.xlane.f32.xlu0 %v578_v44 }
 0x1fa   :  { %829 = vrot.lane.b32.xlu0 %v4693_v21, %s4568_s8 }
 0x1fe   :  { %825 = vrot.lane.b32.xlu0 %v4702_v29, %s4568_s8 }
 0x269   :  { %v577_v46 = vpop.xlane.xlu0 %576 }
 0x26a   :  { %v581_v47 = vsub.f32 %v494_v39, %v577_v46 }
 0x26c   :  { %v583_v48 = vmul.f32 1.442695, %v581_v47 }
 0x26d   :  { %v580_v49 = vpop.xlane.xlu0 %579 }
 0x26e   :  { %4344 = vpow2.f32 %v583_v48  ;;  %v582_v50 = vsub.f32 %v570_v43, %v580_v49 }
 0x270   :  { %v585_v51 = vmul.f32 1.442695, %v582_v50 }
 0x271   :  { %v830_v1 = vpop.permute.xlu0 %829 }
 0x272   :  { %4346 = vpow2.f32 %v585_v51 }
 0x275   :  { %v826_v3 = vpop.permute.xlu0 %825 }
 0x27b   :  { %v4345_v52 = vpop.eup %4344 }
 0x27c   :  { %v587_v53 = vsel %vm574_vm3, %v4345_v52, 0.0 }
 0x27d   :  { %588 = vadd.xlane.f32.xlu1 %v587_v53 }
 0x27f   :  { %v4347_v54 = vpop.eup %4346 }
 0x280   :  { %v590_v55 = vsel %vm574_vm3, %v4347_v54, 0.0 }
 0x281   :  { %591 = vadd.xlane.f32.xlu1 %v590_v55 }
 0x292   :  { %909 = vrot.lane.b32.xlu1 %v4700_v28, %s4568_s8 }
 0x296   :  { %827 = vrot.lane.b32.xlu1 %v4698_v27, %s4568_s8 }
 0x29a   :  { %907 = vrot.lane.b32.xlu1 %v4710_v31, %s4568_s8 }
 0x306   :  { %v589_v56 = vpop.xlane.xlu1 %588 }
 0x307   :  { %4348 = vrcp.f32 %v589_v56 }
 0x30a   :  { %v592_v57 = vpop.xlane.xlu1 %591 }
 0x30b   :  { %4350 = vrcp.f32 %v592_v57 }
 0x30e   :  { %v910_v62 = vpop.permute.xlu1 %909 }
 0x312   :  { %v828_v2 = vpop.permute.xlu1 %827 }
 0x314   :  { %v4349_v58 = vpop.eup %4348 }
 0x315   :  { %v595_v59 = vmul.f32 %v4349_v58, %v4345_v52  ;;  %v1169_v52 = vld [vmem:[#allocation11 + $0x4] sm:$0xf] }
 0x316   :  { %v908_v10 = vpop.permute.xlu1 %907 }
 0x317   :  { %4079 = vmatmul.mubr.msk.f32.vlgmr.msra.gmra.mxu1 %vm597_vm4, %v595_v59 }
 0x318   :  { %v4351_v60 = vpop.eup %4350  ;;  %4082 = vmatpush3.msra.mxu1 %v4732_v38  ;;  %4085 = vmatprep.mubr.msk.f32.mxu1 %vm4567_vm0, %v4566_v0 }
 0x319   :  { %4083 = vmatprep.subr.mxu1 %v4566_v0  ;;  %v596_v63 = vmul.f32 %v4351_v60, %v4347_v54 }
 0x31a   :  { %4084 = vmatpush3.msra.mxu1 %v4751_v61 }
 0x31b   :  { %4093 = vmatprep.subr.mxu1 %v4566_v0  ;;  %4086 = vmatmul.mubr.msk.f32.vlgmr.msra.gmra.mxu1 %vm597_vm4, %v596_v63 }
 0x31c   :  { %4094 = vmatpush3.xpose.msk.msra.mxu1 %vm418_vm2, %v830_v1  ;;  %4097 = vmatprep.mubr.msk.f32.mxu1 %vm4567_vm0, %v4566_v0 }
 0x31d   :  { %4095 = vmatprep.subr.mxu1 %v4566_v0 }
 0x320   :  { %4096 = vmatpush3.xpose.msk.msra.mxu1 %vm418_vm2, %v828_v2 }
 0x321   :  { %4107 = vmatprep.subr.mxu1 %v4566_v0 }
 0x323   :  { %4098 = vmatmul.mubr.msk.f32.vlgmr.msra.gmra.mxu1 %vm418_vm2, %v826_v3 }
 0x324   :  { %4111 = vmatprep.mubr.msk.f32.mxu1 %vm4567_vm0, %v4566_v0 }
 0x3d7   :  { %v667_v5 = vpop.f32.mrf.mxu1 }
 0x3d9   :  { %v4080_v6 = vpop.f32.mrf.mxu1 }
 0x3db   :  { %v740_v7 = vpop.f32.mrf.mxu1 }
 0x3dc   :  { %v747_v8 = vcombine.low %v667_v5, %v740_v7 }
 0x3dd   :  { %v4087_v9 = vpop.f32.mrf.mxu1 }
 0x3de   :  { %4091 = vmatmul.mubr.msk.f32.vlgmr.msra.gmra.mxu0 %vm418_vm2, %v747_v8 }
 0x3df   :  { %4101 = vmatpush3.xpose.msk.msra.mxu0 %vm418_vm2, %v910_v62  ;;  %4104 = vmatprep.mubr.msk.f32.mxu0 %vm4567_vm0, %v4566_v0 }
 0x3e0   :  { %4102 = vmatprep.subr.mxu0 %v4566_v0 }
 0x3e3   :  { %v903_v11 = vpop.f32.mrf.mxu1  ;;  %4103 = vmatpush3.xpose.msk.msra.mxu0 %vm418_vm2, %v908_v10 }
 0x3e4   :  { %v985_v12 = vsel %vm574_vm3, %v903_v11, -inf  ;;  %4114 = vmatprep.subr.mxu0 %v4566_v0 }
 0x3e5   :  { %986 = vmax.xlane.f32.xlu1 %v985_v12  ;;  %v4099_v13 = vpop.f32.mrf.mxu1 }
 0x3e6   :  { %4105 = vmatmul.mubr.msk.f32.vlgmr.msra.gmra.mxu0 %vm418_vm2, %v826_v3 }
 0x3e7   :  { %4118 = vmatprep.mubr.msk.f32.mxu0 %vm4567_vm0, %v4566_v0 }
 0x3f6   :  { %1011 = vrot.lane.b32.xlu1 %v4726_v34, %s4568_s8 }
 0x3fa   :  { %1009 = vrot.lane.b32.xlu1 %v4728_v36, %s4568_s8 }
 0x3fe   :  { %1090 = vrot.lane.b32.xlu1 %v4751_v61, %s4568_s8 }
 0x402   :  { %1253 = vrot.lane.b32.xlu1 %v4693_v21, %s4569_s23 }
 0x406   :  { %1251 = vrot.lane.b32.xlu1 %v4698_v27, %s4569_s23 }
 0x40a   :  { %1249 = vrot.lane.b32.xlu1 %v4702_v29, %s4569_s23 }
 0x46e   :  { %v987_v14 = vpop.xlane.xlu1 %986 }
 0x46f   :  { %v991_v17 = vsub.f32 %v903_v11, %v987_v14 }
 0x471   :  { %v993_v18 = vmul.f32 1.442695, %v991_v17 }
 0x472   :  { %v1012_v15 = vpop.permute.xlu1 %1011 }
 0x473   :  { %4108 = vmatpush3.msra.mxu1 %v1012_v15  ;;  %4352 = vpow2.f32 %v993_v18 }
 0x474   :  { %4109 = vmatprep.subr.mxu1 %v4566_v0 }
 0x476   :  { %v1010_v16 = vpop.permute.xlu1 %1009 }
 0x477   :  { %4110 = vmatpush3.msra.mxu1 %v1010_v16 }
 0x478   :  { %4121 = vmatprep.subr.mxu1 %v4566_v0 }
 0x47a   :  { %v1091_v44 = vpop.permute.xlu1 %1090 }
 0x47e   :  { %v1254_v45 = vpop.permute.xlu1 %1253 }
 0x480   :  { %v4353_v24 = vpop.eup %4352 }
 0x481   :  { %v997_v26 = vsel %vm574_vm3, %v4353_v24, 0.0 }
 0x482   :  { %v1252_v48 = vpop.permute.xlu1 %1251 }
 0x486   :  { %v1250_v49 = vpop.permute.xlu1 %1249 }
 0x49e   :  { %v4796_v19 = vpop.f32.mrf.mxu0 }
 0x49f   :  { %v824_v5 = vadd.f32 %v3807_v4, %v4796_v19 }
 0x4a0   :  { %v4092_v20 = vpop.f32.mrf.mxu0 }
 0x4a6   :  { %v981_v22 = vpop.f32.mrf.mxu0 }
 0x4a7   :  { %v988_v23 = vsel %vm574_vm3, %v981_v22, -inf }
 0x4a8   :  { %989 = vmax.xlane.f32.xlu0 %v988_v23  ;;  %v4106_v25 = vpop.f32.mrf.mxu0 }
 0x4ac   :  { %998 = vadd.xlane.f32.xlu0 %v997_v26 }
 0x531   :  { %v990_v30 = vpop.xlane.xlu0 %989 }
 0x532   :  { %v992_v32 = vsub.f32 %v981_v22, %v990_v30 }
 0x534   :  { %v995_v33 = vmul.f32 1.442695, %v992_v32 }
 0x535   :  { %v999_v35 = vpop.xlane.xlu0 %998 }
 0x536   :  { %4354 = vpow2.f32 %v995_v33 }
 0x537   :  { %4356 = vrcp.f32 %v999_v35 }
 0x543   :  { %v4355_v37 = vpop.eup %4354 }
 0x544   :  { %v4357_v39 = vpop.eup %4356  ;;  %v1000_v40 = vsel %vm574_vm3, %v4355_v37, 0.0 }
 0x545   :  { %1001 = vadd.xlane.f32.xlu0 %v1000_v40  ;;  %v1005_v41 = vmul.f32 %v4357_v39, %v4353_v24 }
 0x547   :  { %4112 = vmatmul.mubr.msk.f32.vlgmr.msra.gmra.mxu1 %vm597_vm4, %v1005_v41 }
 0x548   :  { %4123 = vmatprep.mubr.msk.f32.mxu1 %vm4567_vm0, %v4566_v0  ;;  %4122 = vmatpush3.msk.msra.mxu1 %vm750_vm5, %v1169_v52 }
 0x549   :  { %4133 = vmatprep.subr.mxu1 %v4566_v0 }
 0x55b   :  { %1092 = vrot.lane.b32.xlu0 %v4732_v38, %s4568_s8 }
 0x55f   :  { %1333 = vrot.lane.b32.xlu0 %v4700_v28, %s4569_s23 }
 0x563   :  { %1331 = vrot.lane.b32.xlu0 %v4710_v31, %s4569_s23 }
 0x5ce   :  { %v1002_v42 = vpop.xlane.xlu0 %1001 }
 0x5cf   :  { %4358 = vrcp.f32 %v1002_v42 }
 0x5d2   :  { %v1093_v43 = vpop.permute.xlu0 %1092 }
 0x5d3   :  { %4115 = vmatpush3.msra.mxu0 %v1093_v43 }
 0x5d4   :  { %4116 = vmatprep.subr.mxu0 %v4566_v0 }
 0x5d5   :  { %4117 = vmatpush3.msra.mxu0 %v1091_v44 }
 0x5d6   :  { %4126 = vmatprep.subr.mxu0 %v4566_v0  ;;  %v1334_v54 = vpop.permute.xlu0 %1333 }
 0x5da   :  { %v1332_v57 = vpop.permute.xlu0 %1331 }
 0x5dc   :  { %v4359_v46 = vpop.eup %4358 }
 0x5dd   :  { %v1006_v47 = vmul.f32 %v4359_v46, %v4355_v37  ;;  %v1589_v37 = vld [vmem:[#allocation11 + $0x8] sm:$0xf] }
 0x5df   :  { %4119 = vmatmul.mubr.msk.f32.vlgmr.msra.gmra.mxu0 %vm597_vm4, %v1006_v47 }
 0x5e0   :  { %4127 = vmatpush3.xpose.msk.msra.mxu0 %vm418_vm2, %v1254_v45  ;;  %4130 = vmatprep.mubr.msk.f32.mxu0 %vm4567_vm0, %v4566_v0 }
 0x5e1   :  { %4128 = vmatprep.subr.mxu0 %v4566_v0 }
 0x5e4   :  { %4129 = vmatpush3.xpose.msk.msra.mxu0 %vm418_vm2, %v1252_v48 }
 0x5e5   :  { %4140 = vmatprep.subr.mxu0 %v4566_v0 }
 0x5e7   :  { %4131 = vmatmul.mubr.msk.f32.vlgmr.msra.gmra.mxu0 %vm418_vm2, %v1250_v49 }
 0x5e8   :  { %4144 = vmatprep.mubr.msk.f32.mxu0 %vm4567_vm0, %v4566_v0 }
 0x607   :  { %v1084_v50 = vpop.f32.mrf.mxu1 }
 0x609   :  { %v4113_v51 = vpop.f32.mrf.mxu1 }
 0x69f   :  { %v1165_v53 = vpop.f32.mrf.mxu0 }
 0x6a0   :  { %v1172_v55 = vcombine.low %v1084_v50, %v1165_v53 }
 0x6a1   :  { %v4120_v56 = vpop.f32.mrf.mxu0 }
 0x6a2   :  { %4124 = vmatmul.mubr.msk.f32.vlgmr.msra.gmra.mxu1 %vm418_vm2, %v1172_v55 }
 0x6a3   :  { %4134 = vmatpush3.xpose.msk.msra.mxu1 %vm418_vm2, %v1334_v54  ;;  %4137 = vmatprep.mubr.msk.f32.mxu1 %vm4567_vm0, %v4566_v0 }
 0x6a4   :  { %4135 = vmatprep.subr.mxu1 %v4566_v0 }
 0x6a7   :  { %v1327_v58 = vpop.f32.mrf.mxu0  ;;  %4136 = vmatpush3.xpose.msk.msra.mxu1 %vm418_vm2, %v1332_v57 }
 0x6a8   :  { %v1409_v59 = vsel %vm574_vm3, %v1327_v58, -inf  ;;  %4147 = vmatprep.subr.mxu1 %v4566_v0 }
 0x6a9   :  { %1410 = vmax.xlane.f32.xlu0 %v1409_v59  ;;  %v4132_v60 = vpop.f32.mrf.mxu0 }
 0x6aa   :  { %4138 = vmatmul.mubr.msk.f32.vlgmr.msra.gmra.mxu1 %vm418_vm2, %v1250_v49 }
 0x6ab   :  { %4151 = vmatprep.mubr.msk.f32.mxu1 %vm4567_vm0, %v4566_v0 }
 0x732   :  { %v1411_v62 = vpop.xlane.xlu0 %1410 }
 0x733   :  { %v1415_v63 = vsub.f32 %v1327_v58, %v1411_v62 }
 0x735   :  { %v1417_v1 = vmul.f32 1.442695, %v1415_v63 }
 0x737   :  { %4360 = vpow2.f32 %v1417_v1 }
 0x744   :  { %v4361_v2 = vpop.eup %4360 }
 0x745   :  { %v1421_v3 = vsel %vm574_vm3, %v4361_v2, 0.0 }
 0x746   :  { %1422 = vadd.xlane.f32.xlu0 %v1421_v3 }
 0x762   :  { %v1244_v6 = vpop.f32.mrf.mxu1 }
 0x763   :  { %v4840_v7 = vadd.f32 %v1244_v6, %v824_v5 }
 0x764   :  { %v4125_v8 = vpop.f32.mrf.mxu1 }
 0x76a   :  { %v1405_v9 = vpop.f32.mrf.mxu1 }
 0x76b   :  { %v1412_v10 = vsel %vm574_vm3, %v1405_v9, -inf }
 0x76c   :  { %1413 = vmax.xlane.f32.xlu1 %v1412_v10  ;;  %v4139_v11 = vpop.f32.mrf.mxu1 }
 0x77d   :  { %1512 = vrot.lane.b32.xlu1 %v4732_v38, %s4569_s23 }
 0x781   :  { %1431 = vrot.lane.b32.xlu1 %v4728_v36, %s4569_s23 }
 0x785   :  { %1510 = vrot.lane.b32.xlu1 %v4751_v61, %s4569_s23 }
 0x789   :  { %1753 = vrot.lane.b32.xlu1 %v4700_v28, %s4570_s9 }
 0x78d   :  { %1751 = vrot.lane.b32.xlu1 %v4710_v31, %s4570_s9 }
 0x7cf   :  { %v1423_v20 = vpop.xlane.xlu0 %1422 }
 0x7f5   :  { %v1414_v12 = vpop.xlane.xlu1 %1413 }
 0x7f6   :  { %v1416_v13 = vsub.f32 %v1405_v9, %v1414_v12 }
 0x7f8   :  { %v1419_v14 = vmul.f32 1.442695, %v1416_v13 }
 0x7f9   :  { %v1513_v15 = vpop.permute.xlu1 %1512 }
 0x7fa   :  { %4362 = vpow2.f32 %v1419_v14  ;;  %4148 = vmatpush3.msra.mxu1 %v1513_v15 }
 0x7fb   :  { %4149 = vmatprep.subr.mxu1 %v4566_v0  ;;  %4364 = vrcp.f32 %v1423_v20 }
 0x7fd   :  { %v1432_v16 = vpop.permute.xlu1 %1431 }
 0x801   :  { %v1511_v17 = vpop.permute.xlu1 %1510 }
 0x802   :  { %4150 = vmatpush3.msra.mxu1 %v1511_v17 }
 0x803   :  { %4159 = vmatprep.subr.mxu1 %v4566_v0 }
 0x805   :  { %v1754_v42 = vpop.permute.xlu1 %1753 }
 0x807   :  { %v4363_v18 = vpop.eup %4362 }
 0x808   :  { %v1424_v19 = vsel %vm574_vm3, %v4363_v18, 0.0  ;;  %v4365_v23 = vpop.eup %4364 }
 0x809   :  { %1425 = vadd.xlane.f32.xlu0 %v1424_v19  ;;  %v1429_v25 = vmul.f32 %v4365_v23, %v4361_v2  ;;  %v1752_v45 = vpop.permute.xlu1 %1751 }
 0x81f   :  { %1433 = vrot.lane.b32.xlu0 %v4726_v34, %s4569_s23 }
 0x823   :  { %1673 = vrot.lane.b32.xlu0 %v4693_v21, %s4570_s9 }
 0x827   :  { %1671 = vrot.lane.b32.xlu0 %v4698_v27, %s4570_s9 }
 0x82b   :  { %1669 = vrot.lane.b32.xlu0 %v4702_v29, %s4570_s9 }
 0x892   :  { %v1426_v22 = vpop.xlane.xlu0 %1425 }
 0x893   :  { %4366 = vrcp.f32 %v1426_v22 }
 0x896   :  { %v1434_v24 = vpop.permute.xlu0 %1433 }
 0x897   :  { %4141 = vmatpush3.msra.mxu0 %v1434_v24 }
 0x898   :  { %4142 = vmatprep.subr.mxu0 %v4566_v0 }
 0x899   :  { %4143 = vmatpush3.msra.mxu0 %v1432_v16 }
 0x89a   :  { %4145 = vmatmul.mubr.msk.f32.vlgmr.msra.gmra.mxu0 %vm597_vm4, %v1429_v25  ;;  %4154 = vmatprep.subr.mxu0 %v4566_v0  ;;  %v1674_v26 = vpop.permute.xlu0 %1673 }
 0x89b   :  { %4156 = vmatprep.mubr.msk.f32.mxu0 %vm4567_vm0, %v4566_v0  ;;  %4155 = vmatpush3.msk.msra.mxu0 %vm750_vm5, %v1589_v37 }
 0x89c   :  { %4166 = vmatprep.subr.mxu0 %v4566_v0 }
 0x89e   :  { %v1672_v33 = vpop.permute.xlu0 %1671 }
 0x8a0   :  { %v4367_v30 = vpop.eup %4366 }
 0x8a1   :  { %v1430_v32 = vmul.f32 %v4367_v30, %v4363_v18  ;;  %v2009_v18 = vld [vmem:[#allocation11 + $0xc] sm:$0xf] }
 0x8a2   :  { %v1670_v35 = vpop.permute.xlu0 %1669 }
 0x8a3   :  { %4152 = vmatmul.mubr.msk.f32.vlgmr.msra.gmra.mxu1 %vm597_vm4, %v1430_v32 }
 0x8a4   :  { %4160 = vmatpush3.xpose.msk.msra.mxu1 %vm418_vm2, %v1674_v26  ;;  %4163 = vmatprep.mubr.msk.f32.mxu1 %vm4567_vm0, %v4566_v0 }
 0x8a5   :  { %4161 = vmatprep.subr.mxu1 %v4566_v0 }
 0x8a8   :  { %4162 = vmatpush3.xpose.msk.msra.mxu1 %vm418_vm2, %v1672_v33 }
 0x8a9   :  { %4173 = vmatprep.subr.mxu1 %v4566_v0 }
 0x8ab   :  { %4164 = vmatmul.mubr.msk.f32.vlgmr.msra.gmra.mxu1 %vm418_vm2, %v1670_v35 }
 0x8ac   :  { %4177 = vmatprep.mubr.msk.f32.mxu1 %vm4567_vm0, %v4566_v0 }
 0x95a   :  { %v1506_v39 = vpop.f32.mrf.mxu0 }
 0x95c   :  { %v4146_v40 = vpop.f32.mrf.mxu0 }
 0x963   :  { %v1585_v41 = vpop.f32.mrf.mxu1 }
 0x964   :  { %v1592_v43 = vcombine.low %v1506_v39, %v1585_v41 }
 0x965   :  { %v4153_v44 = vpop.f32.mrf.mxu1 }
 0x966   :  { %4157 = vmatmul.mubr.msk.f32.vlgmr.msra.gmra.mxu0 %vm418_vm2, %v1592_v43 }
 0x967   :  { %4167 = vmatpush3.xpose.msk.msra.mxu0 %vm418_vm2, %v1754_v42  ;;  %4170 = vmatprep.mubr.msk.f32.mxu0 %vm4567_vm0, %v4566_v0 }
 0x968   :  { %4168 = vmatprep.subr.mxu0 %v4566_v0 }
 0x96b   :  { %v1747_v46 = vpop.f32.mrf.mxu1  ;;  %4169 = vmatpush3.xpose.msk.msra.mxu0 %vm418_vm2, %v1752_v45 }
 0x96c   :  { %v1829_v47 = vsel %vm574_vm3, %v1747_v46, -inf  ;;  %4180 = vmatprep.subr.mxu0 %v4566_v0 }
 0x96d   :  { %1830 = vmax.xlane.f32.xlu1 %v1829_v47  ;;  %v4165_v48 = vpop.f32.mrf.mxu1 }
 0x96e   :  { %4171 = vmatmul.mubr.msk.f32.vlgmr.msra.gmra.mxu0 %vm418_vm2, %v1670_v35 }
 0x96f   :  { %4184 = vmatprep.mubr.msk.f32.mxu0 %vm4567_vm0, %v4566_v0 }
 0x97e   :  { %1853 = vrot.lane.b32.xlu1 %v4726_v34, %s4570_s9 }
 0x982   :  { %1851 = vrot.lane.b32.xlu1 %v4728_v36, %s4570_s9 }
 0x986   :  { %1930 = vrot.lane.b32.xlu1 %v4751_v61, %s4570_s9 }
 0x98a   :  { %2093 = vrot.lane.b32.xlu1 %v4693_v21, %s4571_s26 }
 0x98e   :  { %2091 = vrot.lane.b32.xlu1 %v4698_v27, %s4571_s26 }
 0x992   :  { %2089 = vrot.lane.b32.xlu1 %v4702_v29, %s4571_s26 }
 0x9f6   :  { %v1831_v49 = vpop.xlane.xlu1 %1830 }
 0x9f7   :  { %v1835_v52 = vsub.f32 %v1747_v46, %v1831_v49 }
 0x9f9   :  { %v1837_v53 = vmul.f32 1.442695, %v1835_v52 }
 0x9fa   :  { %v1854_v50 = vpop.permute.xlu1 %1853 }
 0x9fb   :  { %4174 = vmatpush3.msra.mxu1 %v1854_v50  ;;  %4368 = vpow2.f32 %v1837_v53 }
 0x9fc   :  { %4175 = vmatprep.subr.mxu1 %v4566_v0 }
 0x9fe   :  { %v1852_v51 = vpop.permute.xlu1 %1851 }
 0x9ff   :  { %4176 = vmatpush3.msra.mxu1 %v1852_v51 }
 0xa00   :  { %4187 = vmatprep.subr.mxu1 %v4566_v0 }
 0xa02   :  { %v1931_v10 = vpop.permute.xlu1 %1930 }
 0xa06   :  { %v2094_v11 = vpop.permute.xlu1 %2093 }
 0xa08   :  { %v4369_v59 = vpop.eup %4368 }
 0xa09   :  { %v1841_v62 = vsel %vm574_vm3, %v4369_v59, 0.0 }
 0xa0a   :  { %v2092_v14 = vpop.permute.xlu1 %2091 }
 0xa0e   :  { %v2090_v15 = vpop.permute.xlu1 %2089 }
 0xa26   :  { %v1664_v54 = vpop.f32.mrf.mxu0 }
 0xa27   :  { %v4907_v55 = vadd.f32 %v1664_v54, %v4840_v7 }
 0xa28   :  { %v4158_v56 = vpop.f32.mrf.mxu0 }
 0xa2e   :  { %v1825_v57 = vpop.f32.mrf.mxu0 }
 0xa2f   :  { %v1832_v58 = vsel %vm574_vm3, %v1825_v57, -inf }
 0xa30   :  { %1833 = vmax.xlane.f32.xlu0 %v1832_v58  ;;  %v4172_v60 = vpop.f32.mrf.mxu0 }
 0xa34   :  { %1842 = vadd.xlane.f32.xlu0 %v1841_v62 }
 0xab9   :  { %v1834_v63 = vpop.xlane.xlu0 %1833 }
 0xaba   :  { %v1836_v1 = vsub.f32 %v1825_v57, %v1834_v63 }
 0xabc   :  { %v1839_v2 = vmul.f32 1.442695, %v1836_v1 }
 0xabd   :  { %v1843_v3 = vpop.xlane.xlu0 %1842 }
 0xabe   :  { %4370 = vpow2.f32 %v1839_v2  ;;  %v2429_v2 = vld [vmem:[#allocation11 + $0x10] sm:$0xf] }
 0xabf   :  { %4372 = vrcp.f32 %v1843_v3 }
 0xacb   :  { %v4371_v4 = vpop.eup %4370 }
 0xacc   :  { %v4373_v5 = vpop.eup %4372  ;;  %v1844_v6 = vsel %vm574_vm3, %v4371_v4, 0.0 }
 0xacd   :  { %1845 = vadd.xlane.f32.xlu0 %v1844_v6  ;;  %v1849_v7 = vmul.f32 %v4373_v5, %v4369_v59 }
 0xacf   :  { %4178 = vmatmul.mubr.msk.f32.vlgmr.msra.gmra.mxu1 %vm597_vm4, %v1849_v7 }
 0xad0   :  { %4189 = vmatprep.mubr.msk.f32.mxu1 %vm4567_vm0, %v4566_v0  ;;  %4188 = vmatpush3.msk.msra.mxu1 %vm750_vm5, %v2009_v18 }
 0xad1   :  { %4199 = vmatprep.subr.mxu1 %v4566_v0 }
 0xae3   :  { %1932 = vrot.lane.b32.xlu0 %v4732_v38, %s4570_s9 }
 0xae7   :  { %2173 = vrot.lane.b32.xlu0 %v4700_v28, %s4571_s26 }
 0xaeb   :  { %2171 = vrot.lane.b32.xlu0 %v4710_v31, %s4571_s26 }
 0xb56   :  { %v1846_v8 = vpop.xlane.xlu0 %1845 }
 0xb57   :  { %4374 = vrcp.f32 %v1846_v8 }
 0xb5a   :  { %v1933_v9 = vpop.permute.xlu0 %1932 }
 0xb5b   :  { %4181 = vmatpush3.msra.mxu0 %v1933_v9 }
 0xb5c   :  { %4182 = vmatprep.subr.mxu0 %v4566_v0 }
 0xb5d   :  { %4183 = vmatpush3.msra.mxu0 %v1931_v10 }
 0xb5e   :  { %4192 = vmatprep.subr.mxu0 %v4566_v0  ;;  %v2174_v20 = vpop.permute.xlu0 %2173 }
 0xb62   :  { %v2172_v24 = vpop.permute.xlu0 %2171 }
 0xb64   :  { %v4375_v12 = vpop.eup %4374 }
 0xb65   :  { %v1850_v13 = vmul.f32 %v4375_v12, %v4371_v4 }
 0xb67   :  { %4185 = vmatmul.mubr.msk.f32.vlgmr.msra.gmra.mxu0 %vm597_vm4, %v1850_v13 }
 0xb68   :  { %4193 = vmatpush3.xpose.msk.msra.mxu0 %vm418_vm2, %v2094_v11  ;;  %4196 = vmatprep.mubr.msk.f32.mxu0 %vm4567_vm0, %v4566_v0 }
 0xb69   :  { %4194 = vmatprep.subr.mxu0 %v4566_v0 }
 0xb6c   :  { %4195 = vmatpush3.xpose.msk.msra.mxu0 %vm418_vm2, %v2092_v14 }
 0xb6d   :  { %4206 = vmatprep.subr.mxu0 %v4566_v0 }
 0xb6f   :  { %4197 = vmatmul.mubr.msk.f32.vlgmr.msra.gmra.mxu0 %vm418_vm2, %v2090_v15 }
 0xb70   :  { %4210 = vmatprep.mubr.msk.f32.mxu0 %vm4567_vm0, %v4566_v0 }
 0xb8f   :  { %v1926_v16 = vpop.f32.mrf.mxu1 }
 0xb91   :  { %v4179_v17 = vpop.f32.mrf.mxu1 }
 0xc27   :  { %v2005_v19 = vpop.f32.mrf.mxu0 }
 0xc28   :  { %v2012_v22 = vcombine.low %v1926_v16, %v2005_v19 }
 0xc29   :  { %v4186_v23 = vpop.f32.mrf.mxu0 }
 0xc2a   :  { %4190 = vmatmul.mubr.msk.f32.vlgmr.msra.gmra.mxu1 %vm418_vm2, %v2012_v22 }
 0xc2b   :  { %4200 = vmatpush3.xpose.msk.msra.mxu1 %vm418_vm2, %v2174_v20  ;;  %4203 = vmatprep.mubr.msk.f32.mxu1 %vm4567_vm0, %v4566_v0 }
 0xc2c   :  { %4201 = vmatprep.subr.mxu1 %v4566_v0 }
 0xc2f   :  { %v2167_v25 = vpop.f32.mrf.mxu0  ;;  %4202 = vmatpush3.xpose.msk.msra.mxu1 %vm418_vm2, %v2172_v24 }
 0xc30   :  { %v2249_v26 = vsel %vm574_vm3, %v2167_v25, -inf  ;;  %4213 = vmatprep.subr.mxu1 %v4566_v0 }
 0xc31   :  { %2250 = vmax.xlane.f32.xlu0 %v2249_v26  ;;  %v4198_v30 = vpop.f32.mrf.mxu0 }
 0xc32   :  { %4204 = vmatmul.mubr.msk.f32.vlgmr.msra.gmra.mxu1 %vm418_vm2, %v2090_v15 }
 0xc33   :  { %4217 = vmatprep.mubr.msk.f32.mxu1 %vm4567_vm0, %v4566_v0 }
 0xcba   :  { %v2251_v32 = vpop.xlane.xlu0 %2250 }
 0xcbb   :  { %v2255_v33 = vsub.f32 %v2167_v25, %v2251_v32 }
 0xcbd   :  { %v2257_v35 = vmul.f32 1.442695, %v2255_v33 }
 0xcbf   :  { %4376 = vpow2.f32 %v2257_v35 }
 0xccc   :  { %v4377_v37 = vpop.eup %4376 }
 0xccd   :  { %v2261_v39 = vsel %vm574_vm3, %v4377_v37, 0.0 }
 0xcce   :  { %2262 = vadd.xlane.f32.xlu0 %v2261_v39 }
 0xcea   :  { %v2084_v40 = vpop.f32.mrf.mxu1 }
 0xceb   :  { %v4948_v41 = vadd.f32 %v2084_v40, %v4907_v55 }
 0xcec   :  { %v4191_v42 = vpop.f32.mrf.mxu1 }
 0xcf2   :  { %v2245_v43 = vpop.f32.mrf.mxu1 }
 0xcf3   :  { %v2252_v44 = vsel %vm574_vm3, %v2245_v43, -inf }
 0xcf4   :  { %2253 = vmax.xlane.f32.xlu1 %v2252_v44  ;;  %v4205_v45 = vpop.f32.mrf.mxu1 }
 0xd05   :  { %2352 = vrot.lane.b32.xlu1 %v4732_v38, %s4571_s26 }
 0xd09   :  { %2271 = vrot.lane.b32.xlu1 %v4728_v36, %s4571_s26 }
 0xd0d   :  { %2350 = vrot.lane.b32.xlu1 %v4751_v61, %s4571_s26 }
 0xd11   :  { %2593 = vrot.lane.b32.xlu1 %v4700_v28, %s4572_s1 }
 0xd15   :  { %2591 = vrot.lane.b32.xlu1 %v4710_v31, %s4572_s1 }
 0xd57   :  { %v2263_v54 = vpop.xlane.xlu0 %2262 }
 0xd7d   :  { %v2254_v46 = vpop.xlane.xlu1 %2253 }
 0xd7e   :  { %v2256_v47 = vsub.f32 %v2245_v43, %v2254_v46 }
 0xd80   :  { %v2259_v48 = vmul.f32 1.442695, %v2256_v47 }
 0xd81   :  { %v2353_v49 = vpop.permute.xlu1 %2352 }
 0xd82   :  { %4378 = vpow2.f32 %v2259_v48  ;;  %4214 = vmatpush3.msra.mxu1 %v2353_v49 }
 0xd83   :  { %4215 = vmatprep.subr.mxu1 %v4566_v0  ;;  %4380 = vrcp.f32 %v2263_v54 }
 0xd85   :  { %v2272_v50 = vpop.permute.xlu1 %2271 }
 0xd89   :  { %v2351_v51 = vpop.permute.xlu1 %2350 }
 0xd8a   :  { %4216 = vmatpush3.msra.mxu1 %v2351_v51 }
 0xd8b   :  { %4225 = vmatprep.subr.mxu1 %v4566_v0 }
 0xd8d   :  { %v2594_v6 = vpop.permute.xlu1 %2593 }
 0xd8f   :  { %v4379_v52 = vpop.eup %4378 }
 0xd90   :  { %v2264_v53 = vsel %vm574_vm3, %v4379_v52, 0.0  ;;  %v4381_v56 = vpop.eup %4380 }
 0xd91   :  { %2265 = vadd.xlane.f32.xlu0 %v2264_v53  ;;  %v2269_v58 = vmul.f32 %v4381_v56, %v4377_v37  ;;  %v2592_v9 = vpop.permute.xlu1 %2591 }
 0xda7   :  { %2273 = vrot.lane.b32.xlu0 %v4726_v34, %s4571_s26 }
 0xdab   :  { %2513 = vrot.lane.b32.xlu0 %v4693_v21, %s4572_s1 }
 0xdaf   :  { %2511 = vrot.lane.b32.xlu0 %v4698_v27, %s4572_s1 }
 0xdb3   :  { %2509 = vrot.lane.b32.xlu0 %v4702_v29, %s4572_s1 }
 0xe1a   :  { %v2266_v55 = vpop.xlane.xlu0 %2265 }
 0xe1b   :  { %4382 = vrcp.f32 %v2266_v55 }
 0xe1e   :  { %v2274_v57 = vpop.permute.xlu0 %2273 }
 0xe1f   :  { %4207 = vmatpush3.msra.mxu0 %v2274_v57 }
 0xe20   :  { %4208 = vmatprep.subr.mxu0 %v4566_v0 }
 0xe21   :  { %4209 = vmatpush3.msra.mxu0 %v2272_v50 }
 0xe22   :  { %4211 = vmatmul.mubr.msk.f32.vlgmr.msra.gmra.mxu0 %vm597_vm4, %v2269_v58  ;;  %4220 = vmatprep.subr.mxu0 %v4566_v0  ;;  %v2514_v59 = vpop.permute.xlu0 %2513 }
 0xe23   :  { %4222 = vmatprep.mubr.msk.f32.mxu0 %vm4567_vm0, %v4566_v0  ;;  %4221 = vmatpush3.msk.msra.mxu0 %vm750_vm5, %v2429_v2 }
 0xe24   :  { %4232 = vmatprep.subr.mxu0 %v4566_v0 }
 0xe26   :  { %v2512_v63 = vpop.permute.xlu0 %2511 }
 0xe28   :  { %v4383_v60 = vpop.eup %4382 }
 0xe29   :  { %v2270_v62 = vmul.f32 %v4383_v60, %v4379_v52  ;;  %v2849_v52 = vld [vmem:[#allocation11 + $0x14] sm:$0xf] }
 0xe2a   :  { %v2510_v1 = vpop.permute.xlu0 %2509 }
 0xe2b   :  { %4218 = vmatmul.mubr.msk.f32.vlgmr.msra.gmra.mxu1 %vm597_vm4, %v2270_v62 }
 0xe2c   :  { %4226 = vmatpush3.xpose.msk.msra.mxu1 %vm418_vm2, %v2514_v59  ;;  %4229 = vmatprep.mubr.msk.f32.mxu1 %vm4567_vm0, %v4566_v0 }
 0xe2d   :  { %4227 = vmatprep.subr.mxu1 %v4566_v0 }
 0xe30   :  { %4228 = vmatpush3.xpose.msk.msra.mxu1 %vm418_vm2, %v2512_v63 }
 0xe31   :  { %4239 = vmatprep.subr.mxu1 %v4566_v0 }
 0xe33   :  { %4230 = vmatmul.mubr.msk.f32.vlgmr.msra.gmra.mxu1 %vm418_vm2, %v2510_v1 }
 0xe34   :  { %4243 = vmatprep.mubr.msk.f32.mxu1 %vm4567_vm0, %v4566_v0 }
 0xee2   :  { %v2346_v3 = vpop.f32.mrf.mxu0 }
 0xee4   :  { %v4212_v4 = vpop.f32.mrf.mxu0 }
 0xeeb   :  { %v2425_v5 = vpop.f32.mrf.mxu1 }
 0xeec   :  { %v2432_v7 = vcombine.low %v2346_v3, %v2425_v5 }
 0xeed   :  { %v4219_v8 = vpop.f32.mrf.mxu1 }
 0xeee   :  { %4223 = vmatmul.mubr.msk.f32.vlgmr.msra.gmra.mxu0 %vm418_vm2, %v2432_v7 }
 0xeef   :  { %4233 = vmatpush3.xpose.msk.msra.mxu0 %vm418_vm2, %v2594_v6  ;;  %4236 = vmatprep.mubr.msk.f32.mxu0 %vm4567_vm0, %v4566_v0 }
 0xef0   :  { %4234 = vmatprep.subr.mxu0 %v4566_v0 }
 0xef3   :  { %v2587_v10 = vpop.f32.mrf.mxu1  ;;  %4235 = vmatpush3.xpose.msk.msra.mxu0 %vm418_vm2, %v2592_v9 }
 0xef4   :  { %v2669_v11 = vsel %vm574_vm3, %v2587_v10, -inf  ;;  %4246 = vmatprep.subr.mxu0 %v4566_v0 }
 0xef5   :  { %2670 = vmax.xlane.f32.xlu1 %v2669_v11  ;;  %v4231_v12 = vpop.f32.mrf.mxu1 }
 0xef6   :  { %4237 = vmatmul.mubr.msk.f32.vlgmr.msra.gmra.mxu0 %vm418_vm2, %v2510_v1 }
 0xef7   :  { %4250 = vmatprep.mubr.msk.f32.mxu0 %vm4567_vm0, %v4566_v0 }
 0xf06   :  { %2693 = vrot.lane.b32.xlu1 %v4726_v34, %s4572_s1 }
 0xf0a   :  { %2691 = vrot.lane.b32.xlu1 %v4728_v36, %s4572_s1 }
 0xf0e   :  { %2770 = vrot.lane.b32.xlu1 %v4751_v61, %s4572_s1 }
 0xf12   :  { %2933 = vrot.lane.b32.xlu1 %v4693_v21, %s4573_s27 }
 0xf16   :  { %2931 = vrot.lane.b32.xlu1 %v4698_v27, %s4573_s27 }
 0xf1a   :  { %2929 = vrot.lane.b32.xlu1 %v4702_v29, %s4573_s27 }
 0xf7e   :  { %v2671_v13 = vpop.xlane.xlu1 %2670 }
 0xf7f   :  { %v2675_v16 = vsub.f32 %v2587_v10, %v2671_v13 }
 0xf81   :  { %v2677_v17 = vmul.f32 1.442695, %v2675_v16 }
 0xf82   :  { %v2694_v14 = vpop.permute.xlu1 %2693 }
 0xf83   :  { %4240 = vmatpush3.msra.mxu1 %v2694_v14  ;;  %4384 = vpow2.f32 %v2677_v17 }
 0xf84   :  { %4241 = vmatprep.subr.mxu1 %v4566_v0 }
 0xf86   :  { %v2692_v15 = vpop.permute.xlu1 %2691 }
 0xf87   :  { %4242 = vmatpush3.msra.mxu1 %v2692_v15 }
 0xf88   :  { %4253 = vmatprep.subr.mxu1 %v4566_v0 }
 0xf8a   :  { %v2771_v44 = vpop.permute.xlu1 %2770 }
 0xf8e   :  { %v2934_v45 = vpop.permute.xlu1 %2933 }
 0xf90   :  { %v4385_v24 = vpop.eup %4384 }
 0xf91   :  { %v2681_v26 = vsel %vm574_vm3, %v4385_v24, 0.0 }
 0xf92   :  { %v2932_v48 = vpop.permute.xlu1 %2931 }
 0xf96   :  { %v2930_v49 = vpop.permute.xlu1 %2929 }
 0xfae   :  { %v2504_v18 = vpop.f32.mrf.mxu0 }
 0xfaf   :  { %v5015_v19 = vadd.f32 %v2504_v18, %v4948_v41 }
 0xfb0   :  { %v4224_v20 = vpop.f32.mrf.mxu0 }
 0xfb6   :  { %v2665_v22 = vpop.f32.mrf.mxu0 }
 0xfb7   :  { %v2672_v23 = vsel %vm574_vm3, %v2665_v22, -inf }
 0xfb8   :  { %2673 = vmax.xlane.f32.xlu0 %v2672_v23  ;;  %v4238_v25 = vpop.f32.mrf.mxu0 }
 0xfbc   :  { %2682 = vadd.xlane.f32.xlu0 %v2681_v26 }
0x1041   :  { %v2674_v30 = vpop.xlane.xlu0 %2673 }
0x1042   :  { %v2676_v32 = vsub.f32 %v2665_v22, %v2674_v30 }
0x1044   :  { %v2679_v33 = vmul.f32 1.442695, %v2676_v32 }
0x1045   :  { %v2683_v35 = vpop.xlane.xlu0 %2682 }
0x1046   :  { %4386 = vpow2.f32 %v2679_v33 }
0x1047   :  { %4388 = vrcp.f32 %v2683_v35 }
0x1053   :  { %v4387_v37 = vpop.eup %4386 }
0x1054   :  { %v4389_v39 = vpop.eup %4388  ;;  %v2684_v40 = vsel %vm574_vm3, %v4387_v37, 0.0 }
0x1055   :  { %2685 = vadd.xlane.f32.xlu0 %v2684_v40  ;;  %v2689_v41 = vmul.f32 %v4389_v39, %v4385_v24  ;;  %v3269_v24 = vld [vmem:[#allocation11 + $0x18] sm:$0xf] }
0x1057   :  { %4244 = vmatmul.mubr.msk.f32.vlgmr.msra.gmra.mxu1 %vm597_vm4, %v2689_v41 }
0x1058   :  { %4255 = vmatprep.mubr.msk.f32.mxu1 %vm4567_vm0, %v4566_v0  ;;  %4254 = vmatpush3.msk.msra.mxu1 %vm750_vm5, %v2849_v52 }
0x1059   :  { %4265 = vmatprep.subr.mxu1 %v4566_v0 }
0x106b   :  { %2772 = vrot.lane.b32.xlu0 %v4732_v38, %s4572_s1 }
0x106f   :  { %3013 = vrot.lane.b32.xlu0 %v4700_v28, %s4573_s27 }
0x1073   :  { %3011 = vrot.lane.b32.xlu0 %v4710_v31, %s4573_s27 }
0x10de   :  { %v2686_v42 = vpop.xlane.xlu0 %2685 }
0x10df   :  { %4390 = vrcp.f32 %v2686_v42 }
0x10e2   :  { %v2773_v43 = vpop.permute.xlu0 %2772 }
0x10e3   :  { %4247 = vmatpush3.msra.mxu0 %v2773_v43 }
0x10e4   :  { %4248 = vmatprep.subr.mxu0 %v4566_v0 }
0x10e5   :  { %4249 = vmatpush3.msra.mxu0 %v2771_v44 }
0x10e6   :  { %4258 = vmatprep.subr.mxu0 %v4566_v0  ;;  %v3014_v54 = vpop.permute.xlu0 %3013 }
0x10ea   :  { %v3012_v57 = vpop.permute.xlu0 %3011 }
0x10ec   :  { %v4391_v46 = vpop.eup %4390 }
0x10ed   :  { %v2690_v47 = vmul.f32 %v4391_v46, %v4387_v37 }
0x10ef   :  { %4251 = vmatmul.mubr.msk.f32.vlgmr.msra.gmra.mxu0 %vm597_vm4, %v2690_v47 }
0x10f0   :  { %4259 = vmatpush3.xpose.msk.msra.mxu0 %vm418_vm2, %v2934_v45  ;;  %4262 = vmatprep.mubr.msk.f32.mxu0 %vm4567_vm0, %v4566_v0 }
0x10f1   :  { %4260 = vmatprep.subr.mxu0 %v4566_v0 }
0x10f4   :  { %4261 = vmatpush3.xpose.msk.msra.mxu0 %vm418_vm2, %v2932_v48 }
0x10f5   :  { %4272 = vmatprep.subr.mxu0 %v4566_v0 }
0x10f7   :  { %4263 = vmatmul.mubr.msk.f32.vlgmr.msra.gmra.mxu0 %vm418_vm2, %v2930_v49 }
0x10f8   :  { %4276 = vmatprep.mubr.msk.f32.mxu0 %vm4567_vm0, %v4566_v0 }
0x1117   :  { %v2766_v50 = vpop.f32.mrf.mxu1 }
0x1119   :  { %v4245_v51 = vpop.f32.mrf.mxu1 }
0x11af   :  { %v2845_v53 = vpop.f32.mrf.mxu0 }
0x11b0   :  { %v2852_v55 = vcombine.low %v2766_v50, %v2845_v53 }
0x11b1   :  { %v4252_v56 = vpop.f32.mrf.mxu0 }
0x11b2   :  { %4256 = vmatmul.mubr.msk.f32.vlgmr.msra.gmra.mxu1 %vm418_vm2, %v2852_v55 }
0x11b3   :  { %4266 = vmatpush3.xpose.msk.msra.mxu1 %vm418_vm2, %v3014_v54  ;;  %4269 = vmatprep.mubr.msk.f32.mxu1 %vm4567_vm0, %v4566_v0 }
0x11b4   :  { %4267 = vmatprep.subr.mxu1 %v4566_v0 }
0x11b7   :  { %v3007_v58 = vpop.f32.mrf.mxu0  ;;  %4268 = vmatpush3.xpose.msk.msra.mxu1 %vm418_vm2, %v3012_v57 }
0x11b8   :  { %v3089_v59 = vsel %vm574_vm3, %v3007_v58, -inf  ;;  %4279 = vmatprep.subr.mxu1 %v4566_v0 }
0x11b9   :  { %3090 = vmax.xlane.f32.xlu0 %v3089_v59  ;;  %v4264_v60 = vpop.f32.mrf.mxu0 }
0x11ba   :  { %4270 = vmatmul.mubr.msk.f32.vlgmr.msra.gmra.mxu1 %vm418_vm2, %v2930_v49 }
0x11bb   :  { %4283 = vmatprep.mubr.msk.f32.mxu1 %vm4567_vm0, %v4566_v0 }
0x1242   :  { %v3091_v62 = vpop.xlane.xlu0 %3090 }
0x1243   :  { %v3095_v63 = vsub.f32 %v3007_v58, %v3091_v62 }
0x1245   :  { %v3097_v1 = vmul.f32 1.442695, %v3095_v63 }
0x1247   :  { %4392 = vpow2.f32 %v3097_v1 }
0x1254   :  { %v4393_v2 = vpop.eup %4392 }
0x1255   :  { %v3101_v3 = vsel %vm574_vm3, %v4393_v2, 0.0 }
0x1256   :  { %3102 = vadd.xlane.f32.xlu0 %v3101_v3 }
0x1272   :  { %v2924_v4 = vpop.f32.mrf.mxu1 }
0x1273   :  { %v5056_v5 = vadd.f32 %v2924_v4, %v5015_v19 }
0x1274   :  { %v4257_v6 = vpop.f32.mrf.mxu1 }
0x127a   :  { %v3085_v7 = vpop.f32.mrf.mxu1 }
0x127b   :  { %v3092_v8 = vsel %vm574_vm3, %v3085_v7, -inf }
0x127c   :  { %3093 = vmax.xlane.f32.xlu1 %v3092_v8  ;;  %v4271_v9 = vpop.f32.mrf.mxu1 }
0x128d   :  { %3192 = vrot.lane.b32.xlu1 %v4732_v38, %s4573_s27 }
0x1291   :  { %3111 = vrot.lane.b32.xlu1 %v4728_v36, %s4573_s27 }
0x1295   :  { %3190 = vrot.lane.b32.xlu1 %v4751_v61, %s4573_s27 }
0x1299   :  { %3433 = vrot.lane.b32.xlu1 %v4700_v28, %s4574_s28 }
0x129d   :  { %3431 = vrot.lane.b32.xlu1 %v4710_v31, %s4574_s28 }
0x12df   :  { %v3103_v28 = vpop.xlane.xlu0 %3102 }
0x1305   :  { %v3094_v10 = vpop.xlane.xlu1 %3093 }
0x1306   :  { %v3096_v11 = vsub.f32 %v3085_v7, %v3094_v10 }
0x1308   :  { %v3099_v12 = vmul.f32 1.442695, %v3096_v11 }
0x1309   :  { %v3193_v13 = vpop.permute.xlu1 %3192 }
0x130a   :  { %4394 = vpow2.f32 %v3099_v12  ;;  %4280 = vmatpush3.msra.mxu1 %v3193_v13 }
0x130b   :  { %4281 = vmatprep.subr.mxu1 %v4566_v0  ;;  %4396 = vrcp.f32 %v3103_v28 }
0x130d   :  { %v3112_v14 = vpop.permute.xlu1 %3111 }
0x1311   :  { %v3191_v15 = vpop.permute.xlu1 %3190 }
0x1312   :  { %4282 = vmatpush3.msra.mxu1 %v3191_v15 }
0x1313   :  { %4291 = vmatprep.subr.mxu1 %v4566_v0 }
0x1315   :  { %v3434_v32 = vpop.permute.xlu1 %3433 }
0x1317   :  { %v4395_v16 = vpop.eup %4394 }
0x1318   :  { %v3104_v17 = vsel %vm574_vm3, %v4395_v16, 0.0  ;;  %v4397_v18 = vpop.eup %4396 }
0x1319   :  { %3105 = vadd.xlane.f32.xlu0 %v3104_v17  ;;  %v3109_v20 = vmul.f32 %v4397_v18, %v4393_v2  ;;  %v3432_v37 = vpop.permute.xlu1 %3431 }
0x132f   :  { %3113 = vrot.lane.b32.xlu0 %v4726_v34, %s4573_s27 }
0x1333   :  { %3353 = vrot.lane.b32.xlu0 %v4693_v21, %s4574_s28 }
0x1337   :  { %3351 = vrot.lane.b32.xlu0 %v4698_v27, %s4574_s28 }
0x133b   :  { %3349 = vrot.lane.b32.xlu0 %v4702_v29, %s4574_s28 }
0x13a2   :  { %v3106_v31 = vpop.xlane.xlu0 %3105 }
0x13a3   :  { %4398 = vrcp.f32 %v3106_v31 }
0x13a6   :  { %v3114_v19 = vpop.permute.xlu0 %3113 }
0x13a7   :  { %4273 = vmatpush3.msra.mxu0 %v3114_v19 }
0x13a8   :  { %4274 = vmatprep.subr.mxu0 %v4566_v0 }
0x13a9   :  { %4275 = vmatpush3.msra.mxu0 %v3112_v14 }
0x13aa   :  { %4277 = vmatmul.mubr.msk.f32.vlgmr.msra.gmra.mxu0 %vm597_vm4, %v3109_v20  ;;  %4286 = vmatprep.subr.mxu0 %v4566_v0  ;;  %v3354_v21 = vpop.permute.xlu0 %3353 }
0x13ab   :  { %4288 = vmatprep.mubr.msk.f32.mxu0 %vm4567_vm0, %v4566_v0  ;;  %4287 = vmatpush3.msk.msra.mxu0 %vm750_vm5, %v3269_v24 }
0x13ac   :  { %4298 = vmatprep.subr.mxu0 %v4566_v0 }
0x13ae   :  { %v3352_v22 = vpop.permute.xlu0 %3351 }
0x13b0   :  { %v4399_v27 = vpop.eup %4398 }
0x13b1   :  { %v3110_v29 = vmul.f32 %v4399_v27, %v4395_v16 }
0x13b2   :  { %v3350_v23 = vpop.permute.xlu0 %3349 }
0x13b3   :  { %4284 = vmatmul.mubr.msk.f32.vlgmr.msra.gmra.mxu1 %vm597_vm4, %v3110_v29 }
0x13b4   :  { %4292 = vmatpush3.xpose.msk.msra.mxu1 %vm418_vm2, %v3354_v21  ;;  %4295 = vmatprep.mubr.msk.f32.mxu1 %vm4567_vm0, %v4566_v0 }
0x13b5   :  { %4293 = vmatprep.subr.mxu1 %v4566_v0 }
0x13b8   :  { %4294 = vmatpush3.xpose.msk.msra.mxu1 %vm418_vm2, %v3352_v22 }
0x13b9   :  { %4305 = vmatprep.subr.mxu1 %v4566_v0 }
0x13bb   :  { %4296 = vmatmul.mubr.msk.f32.vlgmr.msra.gmra.mxu1 %vm418_vm2, %v3350_v23 }
0x13bc   :  { %4309 = vmatprep.mubr.msk.f32.mxu1 %vm4567_vm0, %v4566_v0 }
0x146a   :  { %v3186_v25 = vpop.f32.mrf.mxu0 }
0x146c   :  { %v4278_v26 = vpop.f32.mrf.mxu0 }
0x1473   :  { %v3265_v30 = vpop.f32.mrf.mxu1 }
0x1474   :  { %v3272_v33 = vcombine.low %v3186_v25, %v3265_v30 }
0x1475   :  { %v4285_v35 = vpop.f32.mrf.mxu1 }
0x1476   :  { %4289 = vmatmul.mubr.msk.f32.vlgmr.msra.gmra.mxu0 %vm418_vm2, %v3272_v33 }
0x1477   :  { %4299 = vmatpush3.xpose.msk.msra.mxu0 %vm418_vm2, %v3434_v32  ;;  %4302 = vmatprep.mubr.msk.f32.mxu0 %vm4567_vm0, %v4566_v0 }
0x1478   :  { %4300 = vmatprep.subr.mxu0 %v4566_v0 }
0x147b   :  { %v3427_v39 = vpop.f32.mrf.mxu1  ;;  %4301 = vmatpush3.xpose.msk.msra.mxu0 %vm418_vm2, %v3432_v37 }
0x147c   :  { %v3509_v40 = vsel %vm574_vm3, %v3427_v39, -inf  ;;  %4312 = vmatprep.subr.mxu0 %v4566_v0 }
0x147d   :  { %3510 = vmax.xlane.f32.xlu1 %v3509_v40  ;;  %v4297_v41 = vpop.f32.mrf.mxu1 }
0x147e   :  { %4303 = vmatmul.mubr.msk.f32.vlgmr.msra.gmra.mxu0 %vm418_vm2, %v3350_v23 }
0x147f   :  { %4316 = vmatprep.mubr.msk.f32.mxu0 %vm4567_vm0, %v4566_v0 }
0x148e   :  { %3533 = vrot.lane.b32.xlu1 %v4726_v34, %s4574_s28 }
0x1492   :  { %3531 = vrot.lane.b32.xlu1 %v4728_v36, %s4574_s28 }
0x1496   :  { %3610 = vrot.lane.b32.xlu1 %v4751_v61, %s4574_s28 }
0x1506   :  { %v3511_v42 = vpop.xlane.xlu1 %3510 }
0x1507   :  { %v3515_v45 = vsub.f32 %v3427_v39, %v3511_v42 }
0x1509   :  { %v3517_v46 = vmul.f32 1.442695, %v3515_v45 }
0x150a   :  { %v3534_v43 = vpop.permute.xlu1 %3533 }
0x150b   :  { %4306 = vmatpush3.msra.mxu1 %v3534_v43  ;;  %4400 = vpow2.f32 %v3517_v46 }
0x150c   :  { %4307 = vmatprep.subr.mxu1 %v4566_v0 }
0x150e   :  { %v3532_v44 = vpop.permute.xlu1 %3531 }
0x150f   :  { %4308 = vmatpush3.msra.mxu1 %v3532_v44 }
0x1510   :  { %4319 = vmatprep.subr.mxu1 %v4566_v0 }
0x1512   :  { %v3611_v63 = vpop.permute.xlu1 %3610 }
0x1518   :  { %v4401_v61 = vpop.eup %4400 }
0x1519   :  { %v3521_v51 = vsel %vm574_vm3, %v4401_v61, 0.0 }
0x1536   :  { %v3344_v47 = vpop.f32.mrf.mxu0 }
0x1537   :  { %v3348_v34 = vadd.f32 %v3344_v47, %v5056_v5  ;;  %v3689_v5 = vld [vmem:[#allocation11 + $0x1c] sm:$0xf] }
0x1538   :  { %v4290_v48 = vpop.f32.mrf.mxu0 }
0x153e   :  { %v3505_v36 = vpop.f32.mrf.mxu0 }
0x153f   :  { %v3512_v49 = vsel %vm574_vm3, %v3505_v36, -inf }
0x1540   :  { %3513 = vmax.xlane.f32.xlu0 %v3512_v49  ;;  %v4304_v50 = vpop.f32.mrf.mxu0 }
0x1544   :  { %3522 = vadd.xlane.f32.xlu0 %v3521_v51 }
0x15c9   :  { %v3514_v52 = vpop.xlane.xlu0 %3513 }
0x15ca   :  { %v3516_v53 = vsub.f32 %v3505_v36, %v3514_v52 }
0x15cc   :  { %v3519_v54 = vmul.f32 1.442695, %v3516_v53 }
0x15cd   :  { %v3523_v55 = vpop.xlane.xlu0 %3522 }
0x15ce   :  { %4402 = vpow2.f32 %v3519_v54 }
0x15cf   :  { %4404 = vrcp.f32 %v3523_v55 }
0x15db   :  { %v4403_v56 = vpop.eup %4402 }
0x15dc   :  { %v4405_v57 = vpop.eup %4404  ;;  %v3524_v58 = vsel %vm574_vm3, %v4403_v56, 0.0 }
0x15dd   :  { %3525 = vadd.xlane.f32.xlu0 %v3524_v58  ;;  %v3529_v59 = vmul.f32 %v4405_v57, %v4401_v61 }
0x15df   :  { %4310 = vmatmul.mubr.msk.f32.vlgmr.msra.gmra.mxu1 %vm597_vm4, %v3529_v59 }
0x15e0   :  { %4321 = vmatprep.mubr.msk.f32.mxu1 %vm4567_vm0, %v4566_v0  ;;  %4320 = vmatpush3.msk.msra.mxu1 %vm750_vm5, %v3689_v5 }
0x15f3   :  { %3612 = vrot.lane.b32.xlu0 %v4732_v38, %s4574_s28 }
0x1666   :  { %v3526_v60 = vpop.xlane.xlu0 %3525 }
0x1667   :  { %4406 = vrcp.f32 %v3526_v60 }
0x166a   :  { %v3613_v62 = vpop.permute.xlu0 %3612 }
0x166b   :  { %4313 = vmatpush3.msra.mxu0 %v3613_v62 }
0x166c   :  { %4314 = vmatprep.subr.mxu0 %v4566_v0 }
0x166d   :  { %4315 = vmatpush3.msra.mxu0 %v3611_v63 }
0x1674   :  { %v4407_v1 = vpop.eup %4406 }
0x1675   :  { %v3530_v2 = vmul.f32 %v4407_v1, %v4403_v56 }
0x1677   :  { %4317 = vmatmul.mubr.msk.f32.vlgmr.msra.gmra.mxu0 %vm597_vm4, %v3530_v2 }
0x169f   :  { %v3606_v3 = vpop.f32.mrf.mxu1 }
0x16a1   :  { %v4311_v4 = vpop.f32.mrf.mxu1 }
0x1737   :  { %v3685_v6 = vpop.f32.mrf.mxu0 }
0x1738   :  { %v3692_v7 = vcombine.low %v3606_v3, %v3685_v6 }
0x1739   :  { %v4318_v38 = vpop.f32.mrf.mxu0 }
0x173a   :  { %4322 = vmatmul.mubr.msk.f32.vlgmr.msra.gmra.mxu1 %vm418_vm2, %v3692_v7 }
0x17fa   :  { %v3764_v8 = vpop.f32.mrf.mxu1 }
0x17fb   :  { %v3768_v0 = vadd.f32 %v3764_v8, %v3348_v34 }
0x17fc   :  { %v4323_v9 = vpop.f32.mrf.mxu1 }
0x17fd   :  { %v3770_v10 = vcombine.high %v3768_v0, %v3768_v0  ;;  %3773 = vst.msk [vmem:[#allocation13] sm:$0xf] %vm3772_vm6, %v3768_v0 }
0x17ff   :  { %3774 = vst.msk [vmem:[#allocation13 + $0x4] sm:$0xf] %vm3772_vm6, %v3770_v10 }
0x1800   :  { %4539 = shalt.err (!%p4536_p6)
}
0x1801   :  { %s4576_s3 = smov 64   ;;  %s4577_s12 = smov 4  }
0x1802   :  { %3786 = dma.vmem_to_hbm [thread:$0]  %s3781_s30, 128, %s5142_s10, [#allocation4], %s4576_s3, %s4576_s3, %s4577_s12  }
0x1803   :  { %4556 = dma.done.wait [#allocation4], 128  }
0x1804   :  { %4557 = vsyncadd [#allocation4], 4294967168 }
0x1805   :  { %3790 = vsyncpa [#allocation3], 1 }
0x1806   :  { %3791 = vsyncpa [#allocation6], 1 }
0x1807   :  { %3792 = vsyncpa [#allocation9], 1 }
0x1808   :  { %3793 = vsyncpa [#allocation12], 1 }
0x1809   :  { %3794 = vsyncpa [#allocation4], 1 }

</bundles_post_ra>
